<compile_context>
chip_gen: v7x
topology: tpu7x:2x2x1
jax: 0.10.0
libtpu: 0.0.40
codegen_flags: <defaults>
</compile_context>

<pallas_src>
import math

import jax
import jax.numpy as jnp
import numpy as np
from jax.experimental import pallas as pl
from jax.experimental.pallas import tpu as pltpu

NEG_SLOPE = 0.2  # nn.LeakyReLU(negative_slope=0.2)


def _leaky(x):
    # max(x, 0.2*x) == LeakyReLU_{0.2}(x) for 0 < slope < 1 (mul + max on VPU).
    return jnp.maximum(x, NEG_SLOPE * x)


def tree_gcn_kernel(t0_ref, t1_ref, wr0_ref, wr1_ref, wb_ref, wle_ref, bias_ref,
                    o_ref):
    """One (batch block, node block) tile per grid step.

    t0_ref : (TB, N0B, F0)      ancestor level tile (tree[-2]), N0B = NT // REP
    t1_ref : (TB, NT,  F1)      current level tile  (tree[-1])
    wr0_ref: (F0, OUT)          W_root[-2] (pre-transposed)
    wr1_ref: (F1, OUT)          W_root[-1] (pre-transposed)
    wb_ref : (NT, F1, DEG*F1)   W_branch tile, native layout
    wle_ref: (F1, OUT)          fused W_loop = wl1 @ wl2 (pre-transposed)
    bias_ref: (1, DEG, OUT)     kept in f32
    o_ref  : (TB, NT, DEG*OUT)  lane-dense output tile
    """
    TB, N0B, F0 = t0_ref.shape
    _, NT, F1 = t1_ref.shape
    OUT = wr0_ref.shape[1]
    K = wb_ref.shape[2]          # DEG * F1
    DEG = K // F1
    REP = NT // N0B

    t0 = t0_ref[...]
    t1 = t1_ref[...]
    wle = wle_ref[...]
    bias = bias_ref[0]                                   # (DEG, OUT), f32

    # ---- root term: batch folded into the MXU M dimension, kept 2-D ----
    r0 = jnp.dot(t0.reshape(TB * N0B, F0), wr0_ref[...],
                 preferred_element_type=jnp.float32)     # (TB*N0B, OUT)
    r1 = jnp.dot(t1.reshape(TB * NT, F1), wr1_ref[...],
                 preferred_element_type=jnp.float32)     # (TB*NT,  OUT)
    # node n = n0*REP + r inherits ancestor n0 (torch repeat(1,1,REP).view):
    # sublane broadcast of r0 over REP, no 5-D epilogue tensors.
    root = (r1.reshape(TB, N0B, REP, OUT)
            + r0.reshape(TB, N0B, 1, OUT)).reshape(TB * NT, OUT)

    # ---- branch upsample: per-node rank-2 MXU matmuls with M = TB ----
    rows = []
    for n in range(NT):              # static; NT is capped by the node tiling
        br_n = jnp.dot(t1[:, n, :], wb_ref[n],
                       preferred_element_type=jnp.float32)   # (TB, DEG*F1)
        rows.append(_leaky(br_n).astype(wle.dtype))
    br = jnp.stack(rows, axis=1)                         # (TB, NT, DEG*F1)

    # ---- fused W_loop per degree: lane-contiguous slices, M = TB*NT ----
    outs = []
    for d in range(DEG):
        lhs = br[:, :, d * F1:(d + 1) * F1].reshape(TB * NT, F1)
        h_d = jnp.dot(lhs, wle, preferred_element_type=jnp.float32)  # (TB*NT, OUT)
        outs.append(_leaky(h_d + root + bias[d:d + 1, :]))
    out = jnp.concatenate(outs, axis=-1)                 # (TB*NT, DEG*OUT)
    o_ref[...] = out.reshape(TB, NT, DEG * OUT).astype(o_ref.dtype)


def _pick_batch_block(B, node_tile, target_rows=256, max_tb=32):
    """Largest divisor of B, capped at B//2 so the parallel batch axis has >= 2
    grid steps (v7x: 2 TensorCores) and at max_tb, stopping once the W_loop
    matmul M dimension (TB * node_tile) reaches ~target_rows."""
    cap = min(max(1, B // 2), max_tb)
    tb = 1
    for cand in range(1, cap + 1):
        if B % cand:
            continue
        tb = cand
        if cand * node_tile >= target_rows:
            break
    return tb


def _pick_node_block(N1, REP, per_node_bytes, budget=12 << 20, max_unroll=64):
    """Largest node tile NT | N1 with NT % (8*REP) == 0 (keeps t0/t1/out tiles
    (8,128)-legal) whose W_branch tile fits `budget` and whose per-node matmul
    unroll stays reasonable.  Falls back to whole-N1 residency when no clean
    tiling exists (TODO(synk): element-granular node tiling for such shapes)."""
    if N1 * per_node_bytes <= budget and N1 <= max_unroll:
        return N1
    step = 8 * REP
    best = None
    for cand in range(step, N1, step):
        if N1 % cand == 0 and cand * per_node_bytes <= budget and cand <= max_unroll:
            best = cand
    return best or N1


def _vmem_cap_bytes():
    """Per-core VMEM we let Mosaic use (leave headroom for internal scratch):
    ~96 MiB on v5e/v6e (128 MiB physical), ~48 MiB on v7x (64 MiB physical)."""
    try:
        return int(pltpu.get_tpu_info().vmem_capacity_bytes * 3 // 4)
    except Exception:
        return 48 << 20  # conservative default that fits every current TPU


def tree_gcn_forward(tree, params, degree, *, batch_block=None, node_block=None,
                     use_bf16=False):
    """Pallas-backed TreeGCN.forward (upsample=True, activation=True).

    Returns tree + [new_level]."""
    t0, t1 = tree[-2], tree[-1]
    B, N0, F0 = t0.shape
    _, N1, F1 = t1.shape
    assert N1 % N0 == 0, (N1, N0)
    wr0, wr1 = params["wr0"], params["wr1"]
    wb, bias = params["wb"], params["bias"]          # wb native (N1, F1, DEG*F1)
    OUT = wr0.shape[1]
    K = degree * F1
    REP = N1 // N0
    assert wb.shape == (N1, F1, K), wb.shape

    # Fuse W_loop offline: Linear(F1->S) o Linear(S->OUT) with no nonlinearity
    # in between -> exact single (F1, OUT) weight (f32, highest precision).
    wle = jnp.dot(params["wl1"], params["wl2"],
                  precision=jax.lax.Precision.HIGHEST,
                  preferred_element_type=jnp.float32)

    # bf16 is profitable on v5e/v6e/v7x alike (bf16-native MXU); accumulation
    # and elementwise math stay f32 inside the kernel.
    # TODO(synk): for the final TreeGAN layer (OUT=3) pad wr0/wr1/wle/bias to a
    # 128-lane OUT and slice on the host to avoid masked partial stores.
    cdt = jnp.bfloat16 if use_bf16 else jnp.float32
    out_dtype = cdt
    t0c, t1c = t0.astype(cdt), t1.astype(cdt)
    wr0c, wr1c, wbc, wlec = (w.astype(cdt) for w in (wr0, wr1, wb, wle))
    biasc = jnp.asarray(bias, jnp.float32)

    isz = jnp.dtype(cdt).itemsize
    osz = jnp.dtype(out_dtype).itemsize
    NT = node_block or _pick_node_block(N1, REP, F1 * K * isz)
    assert N1 % NT == 0 and NT % REP == 0, (N1, NT, REP)
    N0B = NT // REP
    TB = batch_block or _pick_batch_block(B, NT)
    assert B % TB == 0, (B, TB)

    # VMEM budget: varying blocks double-buffered, weights counted at 2 buffers
    # (conservative w.r.t. the Buffered(1) fallback), plus headroom for the f32
    # intermediates (root / branch / h / concat), capped at the per-core VMEM.
    blk_in_bytes = (TB * N0B * F0 + TB * NT * F1) * isz
    blk_out_bytes = TB * NT * degree * OUT * osz
    wb_tile_bytes = NT * F1 * K * isz
    small_w_bytes = (F0 * OUT + 2 * F1 * OUT) * isz + degree * OUT * 4
    f32_tmp_bytes = 4 * (TB * NT * (K + OUT) + 2 * TB * NT * degree * OUT)
    need = int(2 * (blk_in_bytes + blk_out_bytes + wb_tile_bytes)
               + 2 * small_w_bytes + 1.5 * f32_tmp_bytes) + (2 << 20)
    vmem_limit = int(min(_vmem_cap_bytes(), max(32 << 20, need)))

    def _build(single_buffer):
        def wspec(shape, imap, const=True):
            # Constant-index weights fetched once -> single buffering halves
            # their VMEM footprint (biggest effect: W_branch on v7x).
            if single_buffer and const:
                return pl.BlockSpec(shape, imap, pipeline_mode=pl.Buffered(1))
            return pl.BlockSpec(shape, imap)

        grid_spec = pltpu.PrefetchScalarGridSpec(
            num_scalar_prefetch=0,
            grid=(B // TB, N1 // NT),
            in_specs=[
                pl.BlockSpec((TB, N0B, F0), lambda i, j: (i, j, 0)),
                pl.BlockSpec((TB, NT, F1), lambda i, j: (i, j, 0)),
                wspec((F0, OUT), lambda i, j: (0, 0)),
                wspec((F1, OUT), lambda i, j: (0, 0)),
                wspec((NT, F1, K), lambda i, j: (j, 0, 0), const=(NT == N1)),
                wspec((F1, OUT), lambda i, j: (0, 0)),
                wspec((1, degree, OUT), lambda i, j: (0, 0, 0)),
            ],
            out_specs=pl.BlockSpec((TB, NT, degree * OUT),
                                   lambda i, j: (i, j, 0)),
        )
        return pl.pallas_call(
            tree_gcn_kernel,
            out_shape=jax.ShapeDtypeStruct((B, N1, degree * OUT), out_dtype),
            grid_spec=grid_spec,
            compiler_params=pltpu.CompilerParams(
                dimension_semantics=("parallel", "parallel"),
                vmem_limit_bytes=vmem_limit),
        )

    args = (t0c, t1c, wr0c, wr1c, wbc, wlec, biasc)
    if hasattr(pl, "Buffered"):
        try:
            out3 = _build(True)(*args)
        except Exception:
            # pipeline_mode=pl.Buffered(1) unsupported on this JAX version:
            # fall back to default double-buffered weight blocks.
            out3 = _build(False)(*args)
    else:
        out3 = _build(False)(*args)

    # Free (contiguous) view back to the module's (B, node*degree, OUT) layout.
    new_level = out3.reshape(B, N1 * degree, OUT)
    return tree + [new_level]


def tree_gcn_reference(tree, params, degree):
    """Pure-JAX reference matching the PyTorch forward semantics."""
    t0, t1 = tree[-2], tree[-1]
    B, N0, F0 = t0.shape
    _, N1, F1 = t1.shape
    wr0, wr1 = params["wr0"], params["wr1"]
    wl1, wl2 = params["wl1"], params["wl2"]
    wb, bias = params["wb"], params["bias"]
    OUT = wr0.shape[1]

    root = jnp.repeat(t0 @ wr0, N1 // N0, axis=1) + (t1 @ wr1)     # (B, N1, OUT)
    br = jnp.einsum('bnf,nfg->bng', t1, wb)                        # (B, N1, DEG*F1)
    br = jnp.where(br > 0, br, NEG_SLOPE * br).reshape(B, N1 * degree, F1)
    h = (br @ wl1) @ wl2                                           # (B, N1*DEG, OUT)
    out = h + jnp.repeat(root, degree, axis=1) + jnp.tile(bias, (1, N1, 1))
    return jnp.where(out > 0, out, NEG_SLOPE * out)


if __name__ == "__main__":
    # Small TreeGCN config: features=[16, 32, 64], degree=2, support=10,
    # node=8 (current level), upsample=True, activation=True, batch=2.
    B, N0, F0 = 2, 4, 16
    N1, F1 = 8, 32
    OUT = 64
    DEG = 2
    SUPPORT = 10
    S = F1 * SUPPORT

    key = jax.random.PRNGKey(0)
    k = jax.random.split(key, 8)

    def lin_init(kk, fan_in, shape):
        bound = 1.0 / math.sqrt(fan_in)
        return jax.random.uniform(kk, shape, jnp.float32, -bound, bound)

    params = {
        # nn.Linear weights, pre-transposed to (in, out)
        "wr0": lin_init(k[0], F0, (F0, OUT)),
        "wr1": lin_init(k[1], F1, (F1, OUT)),
        "wl1": lin_init(k[2], F1, (F1, S)),
        "wl2": lin_init(k[3], S, (S, OUT)),
        # W_branch: xavier-uniform-like, shape (node, in_feature, degree*in_feature)
        "wb": jax.random.uniform(
            k[4], (N1, F1, DEG * F1), jnp.float32, -1.0, 1.0)
            * (math.sqrt(2.0) * math.sqrt(6.0 / (F1 + DEG * F1))),
        # bias: uniform(-1/sqrt(out), 1/sqrt(out)), shape (1, degree, out_feature)
        "bias": lin_init(k[5], OUT, (1, DEG, OUT)),
    }

    tree = [
        jax.random.normal(k[6], (B, N0, F0), jnp.float32),
        jax.random.normal(k[7], (B, N1, F1), jnp.float32),
    ]

    ref = jax.block_until_ready(tree_gcn_reference(tree, params, DEG))

    # f32 path (exact W_loop fusion; tight tolerance).
    new_tree = tree_gcn_forward(tree, params, DEG)
    out = jax.block_until_ready(new_tree[-1])
    assert out.shape == (B, N1 * DEG, OUT), out.shape
    np.testing.assert_allclose(np.asarray(out), np.asarray(ref),
                               rtol=1e-4, atol=2e-4)

    # bf16 MXU path (valid on v5e/v6e/v7x): bf16 inputs/weights/output,
    # f32 accumulation and f32 elementwise math inside the kernel.
    out_bf16 = jax.block_until_ready(
        tree_gcn_forward(tree, params, DEG, use_bf16=True)[-1])
    np.testing.assert_allclose(np.asarray(out_bf16, dtype=np.float32),
                               np.asarray(ref), rtol=5e-2, atol=5e-2)

    print("KERNEL_OK")
</pallas_src>

<mosaic_0001>
module attributes {stable_mosaic.version = 11 : i64} {
  func.func @tree_gcn_kernel(%arg0: i32, %arg1: i32, %arg2: memref<1x4x16xf32, #tpu.memory_space<vmem>>, %arg3: memref<1x8x32xf32, #tpu.memory_space<vmem>>, %arg4: memref<16x64xf32, #tpu.memory_space<vmem>>, %arg5: memref<32x64xf32, #tpu.memory_space<vmem>>, %arg6: memref<8x32x64xf32, #tpu.memory_space<vmem>>, %arg7: memref<32x64xf32, #tpu.memory_space<vmem>>, %arg8: memref<1x2x64xf32, #tpu.memory_space<vmem>>, %arg9: memref<1x8x128xf32, #tpu.memory_space<vmem>>) attributes {dimension_semantics = [#tpu.dimension_semantics<parallel>, #tpu.dimension_semantics<parallel>], iteration_bounds = array<i64: 2, 1>, scalar_prefetch = 0 : i64, scratch_operands = 0 : i64, tpu.core_type = #tpu.core_type<tc>, window_params = [{transform_indices = @transform_0, window_bounds = array<i64: 1, 4, 16>}, {transform_indices = @transform_1, window_bounds = array<i64: 1, 8, 32>}, {pipeline_mode = #tpu.pipeline_mode<synchronous>, transform_indices = @transform_2, window_bounds = array<i64: 16, 64>}, {pipeline_mode = #tpu.pipeline_mode<synchronous>, transform_indices = @transform_3, window_bounds = array<i64: 32, 64>}, {pipeline_mode = #tpu.pipeline_mode<synchronous>, transform_indices = @transform_4, window_bounds = array<i64: 8, 32, 64>}, {pipeline_mode = #tpu.pipeline_mode<synchronous>, transform_indices = @transform_5, window_bounds = array<i64: 32, 64>}, {pipeline_mode = #tpu.pipeline_mode<synchronous>, transform_indices = @transform_6, window_bounds = array<i64: 1, 2, 64>}, {transform_indices = @transform_7, window_bounds = array<i64: 1, 8, 128>}]} {
    %c0 = arith.constant 0 : index
    %c0_0 = arith.constant 0 : index
    %c0_1 = arith.constant 0 : index
    %0 = vector.load %arg2[%c0, %c0_0, %c0_1] : memref<1x4x16xf32, #tpu.memory_space<vmem>>, vector<1x4x16xf32>
    %c0_2 = arith.constant 0 : index
    %c0_3 = arith.constant 0 : index
    %c0_4 = arith.constant 0 : index
    %1 = vector.load %arg3[%c0_2, %c0_3, %c0_4] : memref<1x8x32xf32, #tpu.memory_space<vmem>>, vector<1x8x32xf32>
    %c0_5 = arith.constant 0 : index
    %c0_6 = arith.constant 0 : index
    %2 = vector.load %arg7[%c0_5, %c0_6] : memref<32x64xf32, #tpu.memory_space<vmem>>, vector<32x64xf32>
    %c0_7 = arith.constant 0 : index
    %c0_8 = arith.constant 0 : index
    %c0_9 = arith.constant 0 : index
    %3 = vector.load %arg8[%c0_7, %c0_8, %c0_9] : memref<1x2x64xf32, #tpu.memory_space<vmem>>, vector<1x2x64xf32>
    %4 = vector.shape_cast %3 : vector<1x2x64xf32> to vector<2x64xf32>
    %5 = vector.shape_cast %0 : vector<1x4x16xf32> to vector<4x16xf32>
    %c0_10 = arith.constant 0 : index
    %c0_11 = arith.constant 0 : index
    %6 = vector.load %arg4[%c0_10, %c0_11] : memref<16x64xf32, #tpu.memory_space<vmem>>, vector<16x64xf32>
    %cst = arith.constant dense<0.000000e+00> : vector<4x64xf32>
    %7 = tpu.matmul %5, %6, %cst {dimension_numbers = #tpu.dot_dimension_numbers<[1], [0], [0], [1], [0, 0, 1, 1], [], []>} : vector<4x16xf32>, vector<16x64xf32>, vector<4x64xf32> -> vector<4x64xf32>
    %8 = vector.shape_cast %1 : vector<1x8x32xf32> to vector<8x32xf32>
    %c0_12 = arith.constant 0 : index
    %c0_13 = arith.constant 0 : index
    %9 = vector.load %arg5[%c0_12, %c0_13] : memref<32x64xf32, #tpu.memory_space<vmem>>, vector<32x64xf32>
    %cst_14 = arith.constant dense<0.000000e+00> : vector<8x64xf32>
    %10 = tpu.matmul %8, %9, %cst_14 {dimension_numbers = #tpu.dot_dimension_numbers<[1], [0], [0], [1], [0, 0, 1, 1], [], []>} : vector<8x32xf32>, vector<32x64xf32>, vector<8x64xf32> -> vector<8x64xf32>
    %11 = vector.shape_cast %10 : vector<8x64xf32> to vector<1x4x2x64xf32>
    %12 = vector.shape_cast %7 : vector<4x64xf32> to vector<1x4x1x64xf32>
    %13 = vector.broadcast %12 : vector<1x4x1x64xf32> to vector<1x4x2x64xf32>
    %14 = arith.addf %11, %13 : vector<1x4x2x64xf32>
    %15 = vector.shape_cast %14 : vector<1x4x2x64xf32> to vector<8x64xf32>
    %16 = vector.extract_strided_slice %1 {offsets = [0, 0, 0], sizes = [1, 1, 32], strides = [1, 1, 1]} : vector<1x8x32xf32> to vector<1x1x32xf32>
    %17 = vector.shape_cast %16 : vector<1x1x32xf32> to vector<1x32xf32>
    %c0_15 = arith.constant 0 : index
    %c0_16 = arith.constant 0 : index
    %c0_17 = arith.constant 0 : index
    %18 = vector.load %arg6[%c0_15, %c0_16, %c0_17] : memref<8x32x64xf32, #tpu.memory_space<vmem>>, vector<1x32x64xf32>
    %19 = vector.shape_cast %18 : vector<1x32x64xf32> to vector<32x64xf32>
    %cst_18 = arith.constant dense<0.000000e+00> : vector<1x64xf32>
    %20 = tpu.matmul %17, %19, %cst_18 {dimension_numbers = #tpu.dot_dimension_numbers<[1], [0], [0], [1], [0, 0, 1, 1], [], []>} : vector<1x32xf32>, vector<32x64xf32>, vector<1x64xf32> -> vector<1x64xf32>
    %cst_19 = arith.constant 2.000000e-01 : f32
    %21 = vector.broadcast %cst_19 : f32 to vector<1x64xf32>
    %22 = arith.mulf %21, %20 : vector<1x64xf32>
    %23 = arith.maximumf %20, %22 : vector<1x64xf32>
    %24 = vector.extract_strided_slice %1 {offsets = [0, 1, 0], sizes = [1, 1, 32], strides = [1, 1, 1]} : vector<1x8x32xf32> to vector<1x1x32xf32>
    %25 = vector.shape_cast %24 : vector<1x1x32xf32> to vector<1x32xf32>
    %c1 = arith.constant 1 : index
    %c0_20 = arith.constant 0 : index
    %c0_21 = arith.constant 0 : index
    %26 = vector.load %arg6[%c1, %c0_20, %c0_21] : memref<8x32x64xf32, #tpu.memory_space<vmem>>, vector<1x32x64xf32>
    %27 = vector.shape_cast %26 : vector<1x32x64xf32> to vector<32x64xf32>
    %cst_22 = arith.constant dense<0.000000e+00> : vector<1x64xf32>
    %28 = tpu.matmul %25, %27, %cst_22 {dimension_numbers = #tpu.dot_dimension_numbers<[1], [0], [0], [1], [0, 0, 1, 1], [], []>} : vector<1x32xf32>, vector<32x64xf32>, vector<1x64xf32> -> vector<1x64xf32>
    %cst_23 = arith.constant 2.000000e-01 : f32
    %29 = vector.broadcast %cst_23 : f32 to vector<1x64xf32>
    %30 = arith.mulf %29, %28 : vector<1x64xf32>
    %31 = arith.maximumf %28, %30 : vector<1x64xf32>
    %32 = vector.extract_strided_slice %1 {offsets = [0, 2, 0], sizes = [1, 1, 32], strides = [1, 1, 1]} : vector<1x8x32xf32> to vector<1x1x32xf32>
    %33 = vector.shape_cast %32 : vector<1x1x32xf32> to vector<1x32xf32>
    %c2 = arith.constant 2 : index
    %c0_24 = arith.constant 0 : index
    %c0_25 = arith.constant 0 : index
    %34 = vector.load %arg6[%c2, %c0_24, %c0_25] : memref<8x32x64xf32, #tpu.memory_space<vmem>>, vector<1x32x64xf32>
    %35 = vector.shape_cast %34 : vector<1x32x64xf32> to vector<32x64xf32>
    %cst_26 = arith.constant dense<0.000000e+00> : vector<1x64xf32>
    %36 = tpu.matmul %33, %35, %cst_26 {dimension_numbers = #tpu.dot_dimension_numbers<[1], [0], [0], [1], [0, 0, 1, 1], [], []>} : vector<1x32xf32>, vector<32x64xf32>, vector<1x64xf32> -> vector<1x64xf32>
    %cst_27 = arith.constant 2.000000e-01 : f32
    %37 = vector.broadcast %cst_27 : f32 to vector<1x64xf32>
    %38 = arith.mulf %37, %36 : vector<1x64xf32>
    %39 = arith.maximumf %36, %38 : vector<1x64xf32>
    %40 = vector.extract_strided_slice %1 {offsets = [0, 3, 0], sizes = [1, 1, 32], strides = [1, 1, 1]} : vector<1x8x32xf32> to vector<1x1x32xf32>
    %41 = vector.shape_cast %40 : vector<1x1x32xf32> to vector<1x32xf32>
    %c3 = arith.constant 3 : index
    %c0_28 = arith.constant 0 : index
    %c0_29 = arith.constant 0 : index
    %42 = vector.load %arg6[%c3, %c0_28, %c0_29] : memref<8x32x64xf32, #tpu.memory_space<vmem>>, vector<1x32x64xf32>
    %43 = vector.shape_cast %42 : vector<1x32x64xf32> to vector<32x64xf32>
    %cst_30 = arith.constant dense<0.000000e+00> : vector<1x64xf32>
    %44 = tpu.matmul %41, %43, %cst_30 {dimension_numbers = #tpu.dot_dimension_numbers<[1], [0], [0], [1], [0, 0, 1, 1], [], []>} : vector<1x32xf32>, vector<32x64xf32>, vector<1x64xf32> -> vector<1x64xf32>
    %cst_31 = arith.constant 2.000000e-01 : f32
    %45 = vector.broadcast %cst_31 : f32 to vector<1x64xf32>
    %46 = arith.mulf %45, %44 : vector<1x64xf32>
    %47 = arith.maximumf %44, %46 : vector<1x64xf32>
    %48 = vector.extract_strided_slice %1 {offsets = [0, 4, 0], sizes = [1, 1, 32], strides = [1, 1, 1]} : vector<1x8x32xf32> to vector<1x1x32xf32>
    %49 = vector.shape_cast %48 : vector<1x1x32xf32> to vector<1x32xf32>
    %c4 = arith.constant 4 : index
    %c0_32 = arith.constant 0 : index
    %c0_33 = arith.constant 0 : index
    %50 = vector.load %arg6[%c4, %c0_32, %c0_33] : memref<8x32x64xf32, #tpu.memory_space<vmem>>, vector<1x32x64xf32>
    %51 = vector.shape_cast %50 : vector<1x32x64xf32> to vector<32x64xf32>
    %cst_34 = arith.constant dense<0.000000e+00> : vector<1x64xf32>
    %52 = tpu.matmul %49, %51, %cst_34 {dimension_numbers = #tpu.dot_dimension_numbers<[1], [0], [0], [1], [0, 0, 1, 1], [], []>} : vector<1x32xf32>, vector<32x64xf32>, vector<1x64xf32> -> vector<1x64xf32>
    %cst_35 = arith.constant 2.000000e-01 : f32
    %53 = vector.broadcast %cst_35 : f32 to vector<1x64xf32>
    %54 = arith.mulf %53, %52 : vector<1x64xf32>
    %55 = arith.maximumf %52, %54 : vector<1x64xf32>
    %56 = vector.extract_strided_slice %1 {offsets = [0, 5, 0], sizes = [1, 1, 32], strides = [1, 1, 1]} : vector<1x8x32xf32> to vector<1x1x32xf32>
    %57 = vector.shape_cast %56 : vector<1x1x32xf32> to vector<1x32xf32>
    %c5 = arith.constant 5 : index
    %c0_36 = arith.constant 0 : index
    %c0_37 = arith.constant 0 : index
    %58 = vector.load %arg6[%c5, %c0_36, %c0_37] : memref<8x32x64xf32, #tpu.memory_space<vmem>>, vector<1x32x64xf32>
    %59 = vector.shape_cast %58 : vector<1x32x64xf32> to vector<32x64xf32>
    %cst_38 = arith.constant dense<0.000000e+00> : vector<1x64xf32>
    %60 = tpu.matmul %57, %59, %cst_38 {dimension_numbers = #tpu.dot_dimension_numbers<[1], [0], [0], [1], [0, 0, 1, 1], [], []>} : vector<1x32xf32>, vector<32x64xf32>, vector<1x64xf32> -> vector<1x64xf32>
    %cst_39 = arith.constant 2.000000e-01 : f32
    %61 = vector.broadcast %cst_39 : f32 to vector<1x64xf32>
    %62 = arith.mulf %61, %60 : vector<1x64xf32>
    %63 = arith.maximumf %60, %62 : vector<1x64xf32>
    %64 = vector.extract_strided_slice %1 {offsets = [0, 6, 0], sizes = [1, 1, 32], strides = [1, 1, 1]} : vector<1x8x32xf32> to vector<1x1x32xf32>
    %65 = vector.shape_cast %64 : vector<1x1x32xf32> to vector<1x32xf32>
    %c6 = arith.constant 6 : index
    %c0_40 = arith.constant 0 : index
    %c0_41 = arith.constant 0 : index
    %66 = vector.load %arg6[%c6, %c0_40, %c0_41] : memref<8x32x64xf32, #tpu.memory_space<vmem>>, vector<1x32x64xf32>
    %67 = vector.shape_cast %66 : vector<1x32x64xf32> to vector<32x64xf32>
    %cst_42 = arith.constant dense<0.000000e+00> : vector<1x64xf32>
    %68 = tpu.matmul %65, %67, %cst_42 {dimension_numbers = #tpu.dot_dimension_numbers<[1], [0], [0], [1], [0, 0, 1, 1], [], []>} : vector<1x32xf32>, vector<32x64xf32>, vector<1x64xf32> -> vector<1x64xf32>
    %cst_43 = arith.constant 2.000000e-01 : f32
    %69 = vector.broadcast %cst_43 : f32 to vector<1x64xf32>
    %70 = arith.mulf %69, %68 : vector<1x64xf32>
    %71 = arith.maximumf %68, %70 : vector<1x64xf32>
    %72 = vector.extract_strided_slice %1 {offsets = [0, 7, 0], sizes = [1, 1, 32], strides = [1, 1, 1]} : vector<1x8x32xf32> to vector<1x1x32xf32>
    %73 = vector.shape_cast %72 : vector<1x1x32xf32> to vector<1x32xf32>
    %c7 = arith.constant 7 : index
    %c0_44 = arith.constant 0 : index
    %c0_45 = arith.constant 0 : index
    %74 = vector.load %arg6[%c7, %c0_44, %c0_45] : memref<8x32x64xf32, #tpu.memory_space<vmem>>, vector<1x32x64xf32>
    %75 = vector.shape_cast %74 : vector<1x32x64xf32> to vector<32x64xf32>
    %cst_46 = arith.constant dense<0.000000e+00> : vector<1x64xf32>
    %76 = tpu.matmul %73, %75, %cst_46 {dimension_numbers = #tpu.dot_dimension_numbers<[1], [0], [0], [1], [0, 0, 1, 1], [], []>} : vector<1x32xf32>, vector<32x64xf32>, vector<1x64xf32> -> vector<1x64xf32>
    %cst_47 = arith.constant 2.000000e-01 : f32
    %77 = vector.broadcast %cst_47 : f32 to vector<1x64xf32>
    %78 = arith.mulf %77, %76 : vector<1x64xf32>
    %79 = arith.maximumf %76, %78 : vector<1x64xf32>
    %80 = vector.shape_cast %23 : vector<1x64xf32> to vector<1x1x64xf32>
    %81 = vector.shape_cast %31 : vector<1x64xf32> to vector<1x1x64xf32>
    %82 = vector.shape_cast %39 : vector<1x64xf32> to vector<1x1x64xf32>
    %83 = vector.shape_cast %47 : vector<1x64xf32> to vector<1x1x64xf32>
    %84 = vector.shape_cast %55 : vector<1x64xf32> to vector<1x1x64xf32>
    %85 = vector.shape_cast %63 : vector<1x64xf32> to vector<1x1x64xf32>
    %86 = vector.shape_cast %71 : vector<1x64xf32> to vector<1x1x64xf32>
    %87 = vector.shape_cast %79 : vector<1x64xf32> to vector<1x1x64xf32>
    %88 = tpu.concatenate %80, %81, %82, %83, %84, %85, %86, %87 in 1 : vector<1x1x64xf32>, vector<1x1x64xf32>, vector<1x1x64xf32>, vector<1x1x64xf32>, vector<1x1x64xf32>, vector<1x1x64xf32>, vector<1x1x64xf32>, vector<1x1x64xf32> -> vector<1x8x64xf32>
    %89 = vector.extract_strided_slice %88 {offsets = [0, 0, 0], sizes = [1, 8, 32], strides = [1, 1, 1]} : vector<1x8x64xf32> to vector<1x8x32xf32>
    %90 = vector.shape_cast %89 : vector<1x8x32xf32> to vector<8x32xf32>
    %cst_48 = arith.constant dense<0.000000e+00> : vector<8x64xf32>
    %91 = tpu.matmul %90, %2, %cst_48 {dimension_numbers = #tpu.dot_dimension_numbers<[1], [0], [0], [1], [0, 0, 1, 1], [], []>} : vector<8x32xf32>, vector<32x64xf32>, vector<8x64xf32> -> vector<8x64xf32>
    %92 = arith.addf %91, %15 : vector<8x64xf32>
    %93 = vector.extract_strided_slice %4 {offsets = [0, 0], sizes = [1, 64], strides = [1, 1]} : vector<2x64xf32> to vector<1x64xf32>
    %94 = vector.broadcast %93 : vector<1x64xf32> to vector<8x64xf32>
    %95 = arith.addf %92, %94 : vector<8x64xf32>
    %cst_49 = arith.constant 2.000000e-01 : f32
    %96 = vector.broadcast %cst_49 : f32 to vector<8x64xf32>
    %97 = arith.mulf %96, %95 : vector<8x64xf32>
    %98 = arith.maximumf %95, %97 : vector<8x64xf32>
    %99 = vector.extract_strided_slice %88 {offsets = [0, 0, 32], sizes = [1, 8, 32], strides = [1, 1, 1]} : vector<1x8x64xf32> to vector<1x8x32xf32>
    %100 = vector.shape_cast %99 : vector<1x8x32xf32> to vector<8x32xf32>
    %cst_50 = arith.constant dense<0.000000e+00> : vector<8x64xf32>
    %101 = tpu.matmul %100, %2, %cst_50 {dimension_numbers = #tpu.dot_dimension_numbers<[1], [0], [0], [1], [0, 0, 1, 1], [], []>} : vector<8x32xf32>, vector<32x64xf32>, vector<8x64xf32> -> vector<8x64xf32>
    %102 = arith.addf %101, %15 : vector<8x64xf32>
    %103 = vector.extract_strided_slice %4 {offsets = [1, 0], sizes = [1, 64], strides = [1, 1]} : vector<2x64xf32> to vector<1x64xf32>
    %104 = vector.broadcast %103 : vector<1x64xf32> to vector<8x64xf32>
    %105 = arith.addf %102, %104 : vector<8x64xf32>
    %cst_51 = arith.constant 2.000000e-01 : f32
    %106 = vector.broadcast %cst_51 : f32 to vector<8x64xf32>
    %107 = arith.mulf %106, %105 : vector<8x64xf32>
    %108 = arith.maximumf %105, %107 : vector<8x64xf32>
    %109 = tpu.concatenate %98, %108 in 1 : vector<8x64xf32>, vector<8x64xf32> -> vector<8x128xf32>
    %110 = vector.shape_cast %109 : vector<8x128xf32> to vector<1x8x128xf32>
    %c0_52 = arith.constant 0 : index
    %c0_53 = arith.constant 0 : index
    %c0_54 = arith.constant 0 : index
    %111 = vector.load %arg9[%c0_52, %c0_53, %c0_54] : memref<1x8x128xf32, #tpu.memory_space<vmem>>, vector<1x8x128xf32>
    tpu.vector_store %arg9[%c0_52, %c0_53, %c0_54], %110 {strides = array<i32>} : memref<1x8x128xf32, #tpu.memory_space<vmem>>, vector<1x8x128xf32>,
    return
  }
  func.func @transform_0(%arg0: i32, %arg1: i32) -> (i32, i32, i32) {
    %c0_i32 = arith.constant 0 : i32
    %c0_i32_0 = arith.constant 0 : i32
    return %arg0, %arg1, %c0_i32 : i32, i32, i32
  }
  func.func @transform_1(%arg0: i32, %arg1: i32) -> (i32, i32, i32) {
    %c0_i32 = arith.constant 0 : i32
    %c0_i32_0 = arith.constant 0 : i32
    return %arg0, %arg1, %c0_i32 : i32, i32, i32
  }
  func.func @transform_2(%arg0: i32, %arg1: i32) -> (i32, i32) {
    %c0_i32 = arith.constant 0 : i32
    %c0_i32_0 = arith.constant 0 : i32
    %c0_i32_1 = arith.constant 0 : i32
    return %c0_i32, %c0_i32_0 : i32, i32
  }
  func.func @transform_3(%arg0: i32, %arg1: i32) -> (i32, i32) {
    %c0_i32 = arith.constant 0 : i32
    %c0_i32_0 = arith.constant 0 : i32
    %c0_i32_1 = arith.constant 0 : i32
    return %c0_i32, %c0_i32_0 : i32, i32
  }
  func.func @transform_4(%arg0: i32, %arg1: i32) -> (i32, i32, i32) {
    %c0_i32 = arith.constant 0 : i32
    %c0_i32_0 = arith.constant 0 : i32
    %c0_i32_1 = arith.constant 0 : i32
    return %arg1, %c0_i32, %c0_i32_0 : i32, i32, i32
  }
  func.func @transform_5(%arg0: i32, %arg1: i32) -> (i32, i32) {
    %c0_i32 = arith.constant 0 : i32
    %c0_i32_0 = arith.constant 0 : i32
    %c0_i32_1 = arith.constant 0 : i32
    return %c0_i32, %c0_i32_0 : i32, i32
  }
  func.func @transform_6(%arg0: i32, %arg1: i32) -> (i32, i32, i32) {
    %c0_i32 = arith.constant 0 : i32
    %c0_i32_0 = arith.constant 0 : i32
    %c0_i32_1 = arith.constant 0 : i32
    %c0_i32_2 = arith.constant 0 : i32
    return %c0_i32, %c0_i32_0, %c0_i32_1 : i32, i32, i32
  }
  func.func @transform_7(%arg0: i32, %arg1: i32) -> (i32, i32, i32) {
    %c0_i32 = arith.constant 0 : i32
    %c0_i32_0 = arith.constant 0 : i32
    return %arg0, %arg1, %c0_i32 : i32, i32, i32
  }
}

module attributes {stable_mosaic.version = 11 : i64} {
  func.func @tree_gcn_kernel(%arg0: i32, %arg1: i32, %arg2: memref<1x4x16xf32, #tpu.memory_space<vmem>>, %arg3: memref<1x8x32xf32, #tpu.memory_space<vmem>>, %arg4: memref<16x64xf32, #tpu.memory_space<vmem>>, %arg5: memref<32x64xf32, #tpu.memory_space<vmem>>, %arg6: memref<8x32x64xf32, #tpu.memory_space<vmem>>, %arg7: memref<32x64xf32, #tpu.memory_space<vmem>>, %arg8: memref<1x2x64xf32, #tpu.memory_space<vmem>>, %arg9: memref<1x8x128xf32, #tpu.memory_space<vmem>>) attributes {dimension_semantics = [#tpu.dimension_semantics<parallel>, #tpu.dimension_semantics<parallel>], iteration_bounds = array<i64: 2, 1>, scalar_prefetch = 0 : i64, scratch_operands = 0 : i64, tpu.core_type = #tpu.core_type<tc>, window_params = [{transform_indices = @transform_0, window_bounds = array<i64: 1, 4, 16>}, {transform_indices = @transform_1, window_bounds = array<i64: 1, 8, 32>}, {pipeline_mode = #tpu.pipeline_mode<synchronous>, transform_indices = @transform_2, window_bounds = array<i64: 16, 64>}, {pipeline_mode = #tpu.pipeline_mode<synchronous>, transform_indices = @transform_3, window_bounds = array<i64: 32, 64>}, {transform_indices = @transform_4, window_bounds = array<i64: 8, 32, 64>}, {pipeline_mode = #tpu.pipeline_mode<synchronous>, transform_indices = @transform_5, window_bounds = array<i64: 32, 64>}, {pipeline_mode = #tpu.pipeline_mode<synchronous>, transform_indices = @transform_6, window_bounds = array<i64: 1, 2, 64>}, {transform_indices = @transform_7, window_bounds = array<i64: 1, 8, 128>}]} {
    %c0 = arith.constant 0 : index
    %c0_0 = arith.constant 0 : index
    %c0_1 = arith.constant 0 : index
    %0 = vector.load %arg2[%c0, %c0_0, %c0_1] : memref<1x4x16xf32, #tpu.memory_space<vmem>>, vector<1x4x16xf32>
    %c0_2 = arith.constant 0 : index
    %c0_3 = arith.constant 0 : index
    %c0_4 = arith.constant 0 : index
    %1 = vector.load %arg3[%c0_2, %c0_3, %c0_4] : memref<1x8x32xf32, #tpu.memory_space<vmem>>, vector<1x8x32xf32>
    %c0_5 = arith.constant 0 : index
    %c0_6 = arith.constant 0 : index
    %2 = vector.load %arg7[%c0_5, %c0_6] : memref<32x64xf32, #tpu.memory_space<vmem>>, vector<32x64xf32>
    %c0_7 = arith.constant 0 : index
    %c0_8 = arith.constant 0 : index
    %c0_9 = arith.constant 0 : index
    %3 = vector.load %arg8[%c0_7, %c0_8, %c0_9] : memref<1x2x64xf32, #tpu.memory_space<vmem>>, vector<1x2x64xf32>
    %4 = vector.shape_cast %3 : vector<1x2x64xf32> to vector<2x64xf32>
    %5 = vector.shape_cast %0 : vector<1x4x16xf32> to vector<4x16xf32>
    %c0_10 = arith.constant 0 : index
    %c0_11 = arith.constant 0 : index
    %6 = vector.load %arg4[%c0_10, %c0_11] : memref<16x64xf32, #tpu.memory_space<vmem>>, vector<16x64xf32>
    %cst = arith.constant dense<0.000000e+00> : vector<4x64xf32>
    %7 = tpu.matmul %5, %6, %cst {dimension_numbers = #tpu.dot_dimension_numbers<[1], [0], [0], [1], [0, 0, 1, 1], [], []>} : vector<4x16xf32>, vector<16x64xf32>, vector<4x64xf32> -> vector<4x64xf32>
    %8 = vector.shape_cast %1 : vector<1x8x32xf32> to vector<8x32xf32>
    %c0_12 = arith.constant 0 : index
    %c0_13 = arith.constant 0 : index
    %9 = vector.load %arg5[%c0_12, %c0_13] : memref<32x64xf32, #tpu.memory_space<vmem>>, vector<32x64xf32>
    %cst_14 = arith.constant dense<0.000000e+00> : vector<8x64xf32>
    %10 = tpu.matmul %8, %9, %cst_14 {dimension_numbers = #tpu.dot_dimension_numbers<[1], [0], [0], [1], [0, 0, 1, 1], [], []>} : vector<8x32xf32>, vector<32x64xf32>, vector<8x64xf32> -> vector<8x64xf32>
    %11 = vector.shape_cast %10 : vector<8x64xf32> to vector<1x4x2x64xf32>
    %12 = vector.shape_cast %7 : vector<4x64xf32> to vector<1x4x1x64xf32>
    %13 = vector.broadcast %12 : vector<1x4x1x64xf32> to vector<1x4x2x64xf32>
    %14 = arith.addf %11, %13 : vector<1x4x2x64xf32>
    %15 = vector.shape_cast %14 : vector<1x4x2x64xf32> to vector<8x64xf32>
    %16 = vector.extract_strided_slice %1 {offsets = [0, 0, 0], sizes = [1, 1, 32], strides = [1, 1, 1]} : vector<1x8x32xf32> to vector<1x1x32xf32>
    %17 = vector.shape_cast %16 : vector<1x1x32xf32> to vector<1x32xf32>
    %c0_15 = arith.constant 0 : index
    %c0_16 = arith.constant 0 : index
    %c0_17 = arith.constant 0 : index
    %18 = vector.load %arg6[%c0_15, %c0_16, %c0_17] : memref<8x32x64xf32, #tpu.memory_space<vmem>>, vector<1x32x64xf32>
    %19 = vector.shape_cast %18 : vector<1x32x64xf32> to vector<32x64xf32>
    %cst_18 = arith.constant dense<0.000000e+00> : vector<1x64xf32>
    %20 = tpu.matmul %17, %19, %cst_18 {dimension_numbers = #tpu.dot_dimension_numbers<[1], [0], [0], [1], [0, 0, 1, 1], [], []>} : vector<1x32xf32>, vector<32x64xf32>, vector<1x64xf32> -> vector<1x64xf32>
    %cst_19 = arith.constant 2.000000e-01 : f32
    %21 = vector.broadcast %cst_19 : f32 to vector<1x64xf32>
    %22 = arith.mulf %21, %20 : vector<1x64xf32>
    %23 = arith.maximumf %20, %22 : vector<1x64xf32>
    %24 = vector.extract_strided_slice %1 {offsets = [0, 1, 0], sizes = [1, 1, 32], strides = [1, 1, 1]} : vector<1x8x32xf32> to vector<1x1x32xf32>
    %25 = vector.shape_cast %24 : vector<1x1x32xf32> to vector<1x32xf32>
    %c1 = arith.constant 1 : index
    %c0_20 = arith.constant 0 : index
    %c0_21 = arith.constant 0 : index
    %26 = vector.load %arg6[%c1, %c0_20, %c0_21] : memref<8x32x64xf32, #tpu.memory_space<vmem>>, vector<1x32x64xf32>
    %27 = vector.shape_cast %26 : vector<1x32x64xf32> to vector<32x64xf32>
    %cst_22 = arith.constant dense<0.000000e+00> : vector<1x64xf32>
    %28 = tpu.matmul %25, %27, %cst_22 {dimension_numbers = #tpu.dot_dimension_numbers<[1], [0], [0], [1], [0, 0, 1, 1], [], []>} : vector<1x32xf32>, vector<32x64xf32>, vector<1x64xf32> -> vector<1x64xf32>
    %cst_23 = arith.constant 2.000000e-01 : f32
    %29 = vector.broadcast %cst_23 : f32 to vector<1x64xf32>
    %30 = arith.mulf %29, %28 : vector<1x64xf32>
    %31 = arith.maximumf %28, %30 : vector<1x64xf32>
    %32 = vector.extract_strided_slice %1 {offsets = [0, 2, 0], sizes = [1, 1, 32], strides = [1, 1, 1]} : vector<1x8x32xf32> to vector<1x1x32xf32>
    %33 = vector.shape_cast %32 : vector<1x1x32xf32> to vector<1x32xf32>
    %c2 = arith.constant 2 : index
    %c0_24 = arith.constant 0 : index
    %c0_25 = arith.constant 0 : index
    %34 = vector.load %arg6[%c2, %c0_24, %c0_25] : memref<8x32x64xf32, #tpu.memory_space<vmem>>, vector<1x32x64xf32>
    %35 = vector.shape_cast %34 : vector<1x32x64xf32> to vector<32x64xf32>
    %cst_26 = arith.constant dense<0.000000e+00> : vector<1x64xf32>
    %36 = tpu.matmul %33, %35, %cst_26 {dimension_numbers = #tpu.dot_dimension_numbers<[1], [0], [0], [1], [0, 0, 1, 1], [], []>} : vector<1x32xf32>, vector<32x64xf32>, vector<1x64xf32> -> vector<1x64xf32>
    %cst_27 = arith.constant 2.000000e-01 : f32
    %37 = vector.broadcast %cst_27 : f32 to vector<1x64xf32>
    %38 = arith.mulf %37, %36 : vector<1x64xf32>
    %39 = arith.maximumf %36, %38 : vector<1x64xf32>
    %40 = vector.extract_strided_slice %1 {offsets = [0, 3, 0], sizes = [1, 1, 32], strides = [1, 1, 1]} : vector<1x8x32xf32> to vector<1x1x32xf32>
    %41 = vector.shape_cast %40 : vector<1x1x32xf32> to vector<1x32xf32>
    %c3 = arith.constant 3 : index
    %c0_28 = arith.constant 0 : index
    %c0_29 = arith.constant 0 : index
    %42 = vector.load %arg6[%c3, %c0_28, %c0_29] : memref<8x32x64xf32, #tpu.memory_space<vmem>>, vector<1x32x64xf32>
    %43 = vector.shape_cast %42 : vector<1x32x64xf32> to vector<32x64xf32>
    %cst_30 = arith.constant dense<0.000000e+00> : vector<1x64xf32>
    %44 = tpu.matmul %41, %43, %cst_30 {dimension_numbers = #tpu.dot_dimension_numbers<[1], [0], [0], [1], [0, 0, 1, 1], [], []>} : vector<1x32xf32>, vector<32x64xf32>, vector<1x64xf32> -> vector<1x64xf32>
    %cst_31 = arith.constant 2.000000e-01 : f32
    %45 = vector.broadcast %cst_31 : f32 to vector<1x64xf32>
    %46 = arith.mulf %45, %44 : vector<1x64xf32>
    %47 = arith.maximumf %44, %46 : vector<1x64xf32>
    %48 = vector.extract_strided_slice %1 {offsets = [0, 4, 0], sizes = [1, 1, 32], strides = [1, 1, 1]} : vector<1x8x32xf32> to vector<1x1x32xf32>
    %49 = vector.shape_cast %48 : vector<1x1x32xf32> to vector<1x32xf32>
    %c4 = arith.constant 4 : index
    %c0_32 = arith.constant 0 : index
    %c0_33 = arith.constant 0 : index
    %50 = vector.load %arg6[%c4, %c0_32, %c0_33] : memref<8x32x64xf32, #tpu.memory_space<vmem>>, vector<1x32x64xf32>
    %51 = vector.shape_cast %50 : vector<1x32x64xf32> to vector<32x64xf32>
    %cst_34 = arith.constant dense<0.000000e+00> : vector<1x64xf32>
    %52 = tpu.matmul %49, %51, %cst_34 {dimension_numbers = #tpu.dot_dimension_numbers<[1], [0], [0], [1], [0, 0, 1, 1], [], []>} : vector<1x32xf32>, vector<32x64xf32>, vector<1x64xf32> -> vector<1x64xf32>
    %cst_35 = arith.constant 2.000000e-01 : f32
    %53 = vector.broadcast %cst_35 : f32 to vector<1x64xf32>
    %54 = arith.mulf %53, %52 : vector<1x64xf32>
    %55 = arith.maximumf %52, %54 : vector<1x64xf32>
    %56 = vector.extract_strided_slice %1 {offsets = [0, 5, 0], sizes = [1, 1, 32], strides = [1, 1, 1]} : vector<1x8x32xf32> to vector<1x1x32xf32>
    %57 = vector.shape_cast %56 : vector<1x1x32xf32> to vector<1x32xf32>
    %c5 = arith.constant 5 : index
    %c0_36 = arith.constant 0 : index
    %c0_37 = arith.constant 0 : index
    %58 = vector.load %arg6[%c5, %c0_36, %c0_37] : memref<8x32x64xf32, #tpu.memory_space<vmem>>, vector<1x32x64xf32>
    %59 = vector.shape_cast %58 : vector<1x32x64xf32> to vector<32x64xf32>
    %cst_38 = arith.constant dense<0.000000e+00> : vector<1x64xf32>
    %60 = tpu.matmul %57, %59, %cst_38 {dimension_numbers = #tpu.dot_dimension_numbers<[1], [0], [0], [1], [0, 0, 1, 1], [], []>} : vector<1x32xf32>, vector<32x64xf32>, vector<1x64xf32> -> vector<1x64xf32>
    %cst_39 = arith.constant 2.000000e-01 : f32
    %61 = vector.broadcast %cst_39 : f32 to vector<1x64xf32>
    %62 = arith.mulf %61, %60 : vector<1x64xf32>
    %63 = arith.maximumf %60, %62 : vector<1x64xf32>
    %64 = vector.extract_strided_slice %1 {offsets = [0, 6, 0], sizes = [1, 1, 32], strides = [1, 1, 1]} : vector<1x8x32xf32> to vector<1x1x32xf32>
    %65 = vector.shape_cast %64 : vector<1x1x32xf32> to vector<1x32xf32>
    %c6 = arith.constant 6 : index
    %c0_40 = arith.constant 0 : index
    %c0_41 = arith.constant 0 : index
    %66 = vector.load %arg6[%c6, %c0_40, %c0_41] : memref<8x32x64xf32, #tpu.memory_space<vmem>>, vector<1x32x64xf32>
    %67 = vector.shape_cast %66 : vector<1x32x64xf32> to vector<32x64xf32>
    %cst_42 = arith.constant dense<0.000000e+00> : vector<1x64xf32>
    %68 = tpu.matmul %65, %67, %cst_42 {dimension_numbers = #tpu.dot_dimension_numbers<[1], [0], [0], [1], [0, 0, 1, 1], [], []>} : vector<1x32xf32>, vector<32x64xf32>, vector<1x64xf32> -> vector<1x64xf32>
    %cst_43 = arith.constant 2.000000e-01 : f32
    %69 = vector.broadcast %cst_43 : f32 to vector<1x64xf32>
    %70 = arith.mulf %69, %68 : vector<1x64xf32>
    %71 = arith.maximumf %68, %70 : vector<1x64xf32>
    %72 = vector.extract_strided_slice %1 {offsets = [0, 7, 0], sizes = [1, 1, 32], strides = [1, 1, 1]} : vector<1x8x32xf32> to vector<1x1x32xf32>
    %73 = vector.shape_cast %72 : vector<1x1x32xf32> to vector<1x32xf32>
    %c7 = arith.constant 7 : index
    %c0_44 = arith.constant 0 : index
    %c0_45 = arith.constant 0 : index
    %74 = vector.load %arg6[%c7, %c0_44, %c0_45] : memref<8x32x64xf32, #tpu.memory_space<vmem>>, vector<1x32x64xf32>
    %75 = vector.shape_cast %74 : vector<1x32x64xf32> to vector<32x64xf32>
    %cst_46 = arith.constant dense<0.000000e+00> : vector<1x64xf32>
    %76 = tpu.matmul %73, %75, %cst_46 {dimension_numbers = #tpu.dot_dimension_numbers<[1], [0], [0], [1], [0, 0, 1, 1], [], []>} : vector<1x32xf32>, vector<32x64xf32>, vector<1x64xf32> -> vector<1x64xf32>
    %cst_47 = arith.constant 2.000000e-01 : f32
    %77 = vector.broadcast %cst_47 : f32 to vector<1x64xf32>
    %78 = arith.mulf %77, %76 : vector<1x64xf32>
    %79 = arith.maximumf %76, %78 : vector<1x64xf32>
    %80 = vector.shape_cast %23 : vector<1x64xf32> to vector<1x1x64xf32>
    %81 = vector.shape_cast %31 : vector<1x64xf32> to vector<1x1x64xf32>
    %82 = vector.shape_cast %39 : vector<1x64xf32> to vector<1x1x64xf32>
    %83 = vector.shape_cast %47 : vector<1x64xf32> to vector<1x1x64xf32>
    %84 = vector.shape_cast %55 : vector<1x64xf32> to vector<1x1x64xf32>
    %85 = vector.shape_cast %63 : vector<1x64xf32> to vector<1x1x64xf32>
    %86 = vector.shape_cast %71 : vector<1x64xf32> to vector<1x1x64xf32>
    %87 = vector.shape_cast %79 : vector<1x64xf32> to vector<1x1x64xf32>
    %88 = tpu.concatenate %80, %81, %82, %83, %84, %85, %86, %87 in 1 : vector<1x1x64xf32>, vector<1x1x64xf32>, vector<1x1x64xf32>, vector<1x1x64xf32>, vector<1x1x64xf32>, vector<1x1x64xf32>, vector<1x1x64xf32>, vector<1x1x64xf32> -> vector<1x8x64xf32>
    %89 = vector.extract_strided_slice %88 {offsets = [0, 0, 0], sizes = [1, 8, 32], strides = [1, 1, 1]} : vector<1x8x64xf32> to vector<1x8x32xf32>
    %90 = vector.shape_cast %89 : vector<1x8x32xf32> to vector<8x32xf32>
    %cst_48 = arith.constant dense<0.000000e+00> : vector<8x64xf32>
    %91 = tpu.matmul %90, %2, %cst_48 {dimension_numbers = #tpu.dot_dimension_numbers<[1], [0], [0], [1], [0, 0, 1, 1], [], []>} : vector<8x32xf32>, vector<32x64xf32>, vector<8x64xf32> -> vector<8x64xf32>
    %92 = arith.addf %91, %15 : vector<8x64xf32>
    %93 = vector.extract_strided_slice %4 {offsets = [0, 0], sizes = [1, 64], strides = [1, 1]} : vector<2x64xf32> to vector<1x64xf32>
    %94 = vector.broadcast %93 : vector<1x64xf32> to vector<8x64xf32>
    %95 = arith.addf %92, %94 : vector<8x64xf32>
    %cst_49 = arith.constant 2.000000e-01 : f32
    %96 = vector.broadcast %cst_49 : f32 to vector<8x64xf32>
    %97 = arith.mulf %96, %95 : vector<8x64xf32>
    %98 = arith.maximumf %95, %97 : vector<8x64xf32>
    %99 = vector.extract_strided_slice %88 {offsets = [0, 0, 32], sizes = [1, 8, 32], strides = [1, 1, 1]} : vector<1x8x64xf32> to vector<1x8x32xf32>
    %100 = vector.shape_cast %99 : vector<1x8x32xf32> to vector<8x32xf32>
    %cst_50 = arith.constant dense<0.000000e+00> : vector<8x64xf32>
    %101 = tpu.matmul %100, %2, %cst_50 {dimension_numbers = #tpu.dot_dimension_numbers<[1], [0], [0], [1], [0, 0, 1, 1], [], []>} : vector<8x32xf32>, vector<32x64xf32>, vector<8x64xf32> -> vector<8x64xf32>
    %102 = arith.addf %101, %15 : vector<8x64xf32>
    %103 = vector.extract_strided_slice %4 {offsets = [1, 0], sizes = [1, 64], strides = [1, 1]} : vector<2x64xf32> to vector<1x64xf32>
    %104 = vector.broadcast %103 : vector<1x64xf32> to vector<8x64xf32>
    %105 = arith.addf %102, %104 : vector<8x64xf32>
    %cst_51 = arith.constant 2.000000e-01 : f32
    %106 = vector.broadcast %cst_51 : f32 to vector<8x64xf32>
    %107 = arith.mulf %106, %105 : vector<8x64xf32>
    %108 = arith.maximumf %105, %107 : vector<8x64xf32>
    %109 = tpu.concatenate %98, %108 in 1 : vector<8x64xf32>, vector<8x64xf32> -> vector<8x128xf32>
    %110 = vector.shape_cast %109 : vector<8x128xf32> to vector<1x8x128xf32>
    %c0_52 = arith.constant 0 : index
    %c0_53 = arith.constant 0 : index
    %c0_54 = arith.constant 0 : index
    %111 = vector.load %arg9[%c0_52, %c0_53, %c0_54] : memref<1x8x128xf32, #tpu.memory_space<vmem>>, vector<1x8x128xf32>
    tpu.vector_store %arg9[%c0_52, %c0_53, %c0_54], %110 {strides = array<i32>} : memref<1x8x128xf32, #tpu.memory_space<vmem>>, vector<1x8x128xf32>,
    return
  }
  func.func @transform_0(%arg0: i32, %arg1: i32) -> (i32, i32, i32) {
    %c0_i32 = arith.constant 0 : i32
    %c0_i32_0 = arith.constant 0 : i32
    return %arg0, %arg1, %c0_i32 : i32, i32, i32
  }
  func.func @transform_1(%arg0: i32, %arg1: i32) -> (i32, i32, i32) {
    %c0_i32 = arith.constant 0 : i32
    %c0_i32_0 = arith.constant 0 : i32
    return %arg0, %arg1, %c0_i32 : i32, i32, i32
  }
  func.func @transform_2(%arg0: i32, %arg1: i32) -> (i32, i32) {
    %c0_i32 = arith.constant 0 : i32
    %c0_i32_0 = arith.constant 0 : i32
    %c0_i32_1 = arith.constant 0 : i32
    return %c0_i32, %c0_i32_0 : i32, i32
  }
  func.func @transform_3(%arg0: i32, %arg1: i32) -> (i32, i32) {
    %c0_i32 = arith.constant 0 : i32
    %c0_i32_0 = arith.constant 0 : i32
    %c0_i32_1 = arith.constant 0 : i32
    return %c0_i32, %c0_i32_0 : i32, i32
  }
  func.func @transform_4(%arg0: i32, %arg1: i32) -> (i32, i32, i32) {
    %c0_i32 = arith.constant 0 : i32
    %c0_i32_0 = arith.constant 0 : i32
    %c0_i32_1 = arith.constant 0 : i32
    return %arg1, %c0_i32, %c0_i32_0 : i32, i32, i32
  }
  func.func @transform_5(%arg0: i32, %arg1: i32) -> (i32, i32) {
    %c0_i32 = arith.constant 0 : i32
    %c0_i32_0 = arith.constant 0 : i32
    %c0_i32_1 = arith.constant 0 : i32
    return %c0_i32, %c0_i32_0 : i32, i32
  }
  func.func @transform_6(%arg0: i32, %arg1: i32) -> (i32, i32, i32) {
    %c0_i32 = arith.constant 0 : i32
    %c0_i32_0 = arith.constant 0 : i32
    %c0_i32_1 = arith.constant 0 : i32
    %c0_i32_2 = arith.constant 0 : i32
    return %c0_i32, %c0_i32_0, %c0_i32_1 : i32, i32, i32
  }
  func.func @transform_7(%arg0: i32, %arg1: i32) -> (i32, i32, i32) {
    %c0_i32 = arith.constant 0 : i32
    %c0_i32_0 = arith.constant 0 : i32
    return %arg0, %arg1, %c0_i32 : i32, i32, i32
  }
}

</mosaic_0001>

<bundles_post_ra>
// kernel: tpu_custom_call.1
= control target key start
LH: loop header
LB: loop body
LE: loop exit
PB: predicated region body
PF: predicated region fallthrough
CT: control target
= control target key end

     0   :  { %s2848_s0 = inlined_call_operand.hbm [shape: f32[2,4,16], index: 0, kind: input, shape index: {}]   ;;  %s2849_s1 = inlined_call_operand.hbm [shape: f32[2,8,32], index: 1, kind: input, shape index: {}]   ;;  %s2850_s2 = inlined_call_operand.hbm [shape: f32[16,64], index: 2, kind: input, shape index: {}]   ;;  %s2851_s3 = inlined_call_operand.hbm [shape: f32[32,64], index: 3, kind: input, shape index: {}]   ;;  %s2852_s4 = inlined_call_operand.hbm [shape: f32[8,32,64], index: 4, kind: input, shape index: {}]   ;;  %s2853_s5 = inlined_call_operand.hbm [shape: f32[32,64], index: 5, kind: input, shape index: {}]   ;;  %s2854_s6 = inlined_call_operand.vmem [shape: f32[1,2,64], index: 6, kind: input, shape index: {}]   ;;  %s2855_s7 = inlined_call_operand.hbm [shape: f32[2,8,128], index: 7, kind: output, shape index: {}]  }
   0x1   :  { %2861 = sst [smem:[#allocation20_spill]] %s2848_s0 }
   0x2   :  { %2862 = sst [smem:[#allocation21_spill]] %s2850_s2 }
   0x3   :  { %2863 = sst [smem:[#allocation22_spill]] %s2851_s3 }
   0x4   :  { %2864 = sst [smem:[#allocation23_spill]] %s2852_s4 }
   0x5   :  { %2865 = sst [smem:[#allocation24_spill]] %s2855_s7 }
   0x6   :  { %12 = vsyncpa [#allocation3], 0 }
   0x7   :  { %14 = vsyncpa [#allocation3 + $0x1], 0 }
   0x8   :  { %15 = vsyncpa [#allocation6], 0 }
   0x9   :  { %17 = vsyncpa [#allocation6 + $0x1], 0 }
   0xa   :  { %18 = vsyncpa [#allocation9], 0 }
   0xb   :  { %19 = vsyncpa [#allocation12], 0 }
   0xc   :  { %20 = vsyncpa [#allocation4], 0 }
   0xd   :  { %22 = vsyncpa [#allocation4 + $0x1], 0  ;;  %s2407_s24 = smov 0   ;;  %s2409_s25 = smov 0  }
   0xe   :  { %s2411_s26 = smov 0   ;;  %s2413_s27 = smov 0  }
   0xf   :  { %s2415_s28 = smov 0   ;;  %s2417_s29 = smov 0  }
  0x10 LB: > { %s2438_s30 = sadd.s32 4294967295, %s2349_s29   ;;  %p1673_p0 = scmp.ge.s32.totalorder %s2349_s29, 1  ;;  %s2349_s29 = sphi %s2417_s29, %s28_s29   ;;  %s2345_s28 = sphi %s2415_s28, %s2896_s28   ;;  %s2341_s27 = sphi %s2413_s27, %s2895_s27   ;;  %s2337_s26 = sphi %s2411_s26, %s2894_s26   ;;  %s2333_s25 = sphi %s2409_s25, %s2893_s25   ;;  %s2329_s24 = sphi %s2407_s24, %s2892_s24  }
  0x11   : > { %p2857_p1 = scmp.eq.s32.totalorder %s2438_s30, 0  ;;  %p239_p2 = scmp.lt.s32.totalorder %s2349_s29, 3 }
  0x12   : > { %s2351_s9 = smov [#allocation7]   ;;  %s2352_s12 = smov [#allocation8]  }
  0x13   : > { %p2443_p3 = pnand %p1673_p0, %p239_p2  ;;  %s251_s10 = sshll.u32 %s2351_s9, 4  ;;  %s2447_s10 = int_to_ptr.vmem [resolvable:$true] %s251_s10 }
  0x14   : > { %s264_s13 = sshll.u32 %s2352_s12, 4  ;;  %s2353_s14 = smov [#allocation10]   ;;  %s2458_s13 = int_to_ptr.vmem [resolvable:$true] %s264_s13 }
  0x15   : > { %s2866_s8 = scalar_select %p2443_p3, 1, 0 }
  0x16   : > { %p1984_p4 = pneg %p2443_p3  ;;  %s2460_s15 = sshll.u32 %s2353_s14, 4  ;;  %s282_s15 = int_to_ptr.vmem [resolvable:$true] %s2460_s15 }
  0x17   : > { %s2868_s2 = sld [smem:[#allocation21_spill]] }
  0x18   : > { %p2454_p6 = pnand %p1984_p4, %p2857_p1 }
  0x1a   : > { %p2470_p8 = pneg %p2454_p6 }
  0x1d   : > { %s2079_s18 = scalar_lea.hbm %s2868_s2, 256 }
  0x1e   : > { %p2080_p7 = scmp.ne.s32.totalorder %s2868_s2, %s2079_s18  ;;  %p2086_p11 = scmp.lt.u32.totalorder %s2079_s18, %s2868_s2 }
  0x20   : > { %p2082_p9 = pnand %p2470_p8, %p2080_p7 }
  0x22   : > { %p2083_p10 = pneg %p2082_p9 }
  0x24   : > { %p2088_p12 = pnand %p2086_p11, %p2083_p10 }
  0x26   : > { %2091 = shalt.err (!%p2088_p12)
}
  0x27   : > { %s2092_s9 = scalar_lea.vmem %s2447_s10, 256  ;;  %p2100_p4 = scmp.lt.s32.totalorder %s2447_s10, %s2447_s10 }
  0x28   : > { %p2093_p13 = scmp.ne.s32.totalorder %s2447_s10, %s2092_s9  ;;  %p2101_p5 = scmp.lt.s32.totalorder %s2092_s9, %s2092_s9 }
  0x2a   : > { %p2095_p0 = pnand %p2093_p13, %p2470_p8  ;;  %p2102_p7 = por %p2101_p5, %p2100_p4 }
  0x2c   : > { %p2096_p2 = pneg %p2095_p0 }
  0x2e   : > { %p2103_p9 = pnand %p2102_p7, %p2096_p2 }
  0x30   : > { %2106 = shalt.err (!%p2103_p9)
}
  0x31   : > { %s2354_s12 = smov 128   ;;  %s2355_s14 = smov 8  }
  0x32   : > { %1987 = dma.hbm_to_vmem [thread:$0]  (!%p2454_p6), %s2868_s2, 256, %s2447_s10, [#allocation6], %s2354_s12, %s2354_s12, %s2355_s14  }
  0x33   : > { %s2870_s3 = sld [smem:[#allocation22_spill]] }
  0x39   : > { %s2107_s20 = scalar_lea.hbm %s2870_s3, 512 }
  0x3a   : > { %p2108_p5 = scmp.ne.s32.totalorder %s2870_s3, %s2107_s20  ;;  %p2114_p12 = scmp.lt.u32.totalorder %s2107_s20, %s2870_s3 }
  0x3c   : > { %p2110_p10 = pnand %p2108_p5, %p2470_p8 }
  0x3e   : > { %p2111_p11 = pneg %p2110_p10 }
  0x40   : > { %p2116_p13 = pnand %p2114_p12, %p2111_p11 }
  0x42   : > { %2119 = shalt.err (!%p2116_p13)
}
  0x43   : > { %s2120_s10 = scalar_lea.vmem %s2458_s13, 512  ;;  %p2128_p7 = scmp.lt.s32.totalorder %s2458_s13, %s2458_s13 }
  0x44   : > { %p2121_p0 = scmp.ne.s32.totalorder %s2458_s13, %s2120_s10  ;;  %p2129_p9 = scmp.lt.s32.totalorder %s2120_s10, %s2120_s10 }
  0x46   : > { %p2123_p2 = pnand %p2121_p0, %p2470_p8  ;;  %p2130_p5 = por %p2129_p9, %p2128_p7 }
  0x48   : > { %p2124_p4 = pneg %p2123_p2 }
  0x4a   : > { %p2131_p10 = pnand %p2130_p5, %p2124_p4 }
  0x4c   : > { %2134 = shalt.err (!%p2131_p10)
}
  0x4d   : > { %1990 = dma.hbm_to_vmem [thread:$0]  (!%p2454_p6), %s2870_s3, 512, %s2458_s13, [#allocation9], %s2354_s12, %s2354_s12, %s2355_s14  }
  0x4e   : > { %s2871_s4 = sld [smem:[#allocation23_spill]] }
  0x54   : > { %s2135_s19 = scalar_lea.hbm %s2871_s4, 4096 }
  0x55   : > { %p2136_p11 = scmp.ne.s32.totalorder %s2871_s4, %s2135_s19  ;;  %p2142_p0 = scmp.lt.u32.totalorder %s2135_s19, %s2871_s4 }
  0x57   : > { %p2138_p12 = pnand %p2136_p11, %p2470_p8 }
  0x59   : > { %p2139_p13 = pneg %p2138_p12 }
  0x5b   : > { %p2144_p2 = pnand %p2142_p0, %p2139_p13 }
  0x5d   : > { %2147 = shalt.err (!%p2144_p2)
}
  0x5e   : > { %s2148_s10 = scalar_lea.vmem %s282_s15, 4096  ;;  %p2156_p5 = scmp.lt.s32.totalorder %s282_s15, %s282_s15 }
  0x5f   : > { %p2149_p4 = scmp.ne.s32.totalorder %s282_s15, %s2148_s10  ;;  %p2157_p10 = scmp.lt.s32.totalorder %s2148_s10, %s2148_s10 }
  0x61   : > { %p2151_p7 = pnand %p2149_p4, %p2470_p8  ;;  %p2158_p1 = por %p2157_p10, %p2156_p5 }
  0x63   : > { %p2152_p9 = pneg %p2151_p7 }
  0x65   : > { %p2159_p3 = pnand %p2158_p1, %p2152_p9 }
  0x67   : > { %2162 = shalt.err (!%p2159_p3)
}
  0x68   : > { %1993 = dma.hbm_to_vmem [thread:$0]  (!%p2454_p6), %s2871_s4, 4096, %s282_s15, [#allocation9], %s2354_s12, %s2354_s12, %s2355_s14  }
  0x69   : > { %s2356_s16 = smov [#allocation11]   ;;  %s2163_s20 = scalar_lea.hbm %s2853_s5, 512 }
  0x6a   : > { %s294_s17 = sshll.u32 %s2356_s16, 4  ;;  %p2164_p1 = scmp.ne.s32.totalorder %s2853_s5, %s2163_s20  ;;  %s295_s17 = int_to_ptr.vmem [resolvable:$true] %s294_s17 }
  0x6b   : > { %p2170_p12 = scmp.lt.u32.totalorder %s2163_s20, %s2853_s5 }
  0x6c   : > { %p2166_p3 = pnand %p2164_p1, %p2470_p8 }
  0x6e   : > { %p2167_p11 = pneg %p2166_p3 }
  0x70   : > { %p2172_p13 = pnand %p2170_p12, %p2167_p11 }
  0x72   : > { %2175 = shalt.err (!%p2172_p13)
}
  0x73   : > { %s2176_s15 = scalar_lea.vmem %s295_s17, 512  ;;  %p2184_p7 = scmp.lt.s32.totalorder %s295_s17, %s295_s17 }
  0x74   : > { %p2177_p0 = scmp.ne.s32.totalorder %s295_s17, %s2176_s15  ;;  %p2185_p9 = scmp.lt.s32.totalorder %s2176_s15, %s2176_s15 }
  0x76   : > { %p2179_p2 = pnand %p2177_p0, %p2470_p8  ;;  %p2186_p5 = por %p2185_p9, %p2184_p7 }
  0x78   : > { %p2180_p4 = pneg %p2179_p2 }
  0x7a   : > { %p2187_p10 = pnand %p2186_p5, %p2180_p4 }
  0x7c   : > { %2190 = shalt.err (!%p2187_p10)
}
  0x7d   : > { %1996 = dma.hbm_to_vmem [thread:$0]  (!%p2454_p6), %s2853_s5, 512, %s295_s17, [#allocation12], %s2354_s12, %s2354_s12, %s2355_s14  }
  0x7e   : > { %s1672_s11 = sadd.s32 4294967294, %s2349_s29   ;;  %s40_s21 = sadd.s32 1, %s2345_s28 }
  0x7f   : > { %p42_p8 = scmp.ge.s32.totalorder %s40_s21, 2  ;;  %s49_s16 = sadd.s32 1, %s2337_s26 }
  0x80   : > { %p56_p1 = scmp.ne.s32.totalorder %s2337_s26, %s2333_s25  ;;  %p57_p3 = scmp.eq.s32.totalorder %s2349_s29, 0 }
  0x81   : > { %s2898_s21 = smov (%p42_p8, %s40_s21), 0  ;;  %p62_p12 = scmp.ne.s32.totalorder %s2333_s25, %s2329_s24 }
  0x82   : > { %p2571_p11 = por %p57_p3, %p56_p1  ;;  %s44_s12 = ssub.s32 %s2345_s28, %s2898_s21 }
  0x83   : > { %p226_p6 = scmp.eq.s32.totalorder %s2438_s30, 1  ;;  %p47_p13 = scmp.eq.s32.totalorder %s44_s12, 0 }
  0x84   : > { %p2873_p0 = scmp.eq.s32.totalorder %s2438_s30, 0  ;;  %p232_p7 = scmp.eq.s32.totalorder %s1672_s11, 1 }
  0x85   : > { %p2586_p4 = por %p226_p6, %p56_p1  ;;  %p2012_p5 = scmp.lt.s32.totalorder %s2349_s29, 2 }
  0x86   : > { %p2582_p2 = por %p2873_p0, %p62_p12  ;;  %p2593_p9 = por %p232_p7, %p62_p12 }
  0x87   : > { %s2875_s17 = scalar_select %p2586_p4, 1, 0 }
  0x88   : > { %s2874_s14 = scalar_select %p2582_p2, 1, 0 }
  0x89   : > { %s2591_s19 = scalar_select %p47_p13, %s2337_s26, %s49_s16  }
  0x8a   : > { %s2876_s20 = scalar_select %p2593_p9, 1, 0 }
  0x8b   : > { %s2599_s22 = sand.u32 1, %s2337_s26   ;;  %s1680_s23 = sshll.u32 %s2345_s28, 6 }
  0x8c   : > { %s1679_s9 = sshll.u32 %s2599_s22, 2  ;;  %s2877_s0 = sld [smem:[#allocation20_spill]] }
  0x8d   : > { %s315_s7 = scalar_lea.vmem [#allocation2], %s1679_s9  ;;  %p2610_p10 = pnand %p2012_p5, %p2571_p11 }
  0x8e   : > { %s323_s11 = sshll.u32 %s315_s7, 4  ;;  %s312_s2 = scalar_lea.sflag [#allocation3], %s2599_s22  ;;  %s2614_s11 = int_to_ptr.vmem [resolvable:$true] %s323_s11 }
  0x8f   : > { %p2193_p1 = pneg %p2610_p10 }
  0x92   : > { %s2606_s13 = scalar_lea.hbm %s2877_s0, %s1680_s23  ;;  %s2196_s9 = scalar_lea.hbm %s2877_s0, 128 }
  0x93   : > { %s2191_s10 = scalar_lea.hbm %s2606_s13, 64  ;;  %p2197_p11 = scmp.lt.u32.totalorder %s2606_s13, %s2877_s0 }
  0x94   : > { %p2192_p8 = scmp.ne.s32.totalorder %s2606_s13, %s2191_s10  ;;  %p2198_p6 = scmp.lt.u32.totalorder %s2196_s9, %s2191_s10 }
  0x95   : > { %p2200_p0 = scmp.lt.u32.totalorder %s2191_s10, %s2606_s13 }
  0x96   : > { %p2194_p3 = pnand %p2193_p1, %p2192_p8  ;;  %p2199_p13 = por %p2198_p6, %p2197_p11 }
  0x98   : > { %p2195_p12 = pneg %p2194_p3  ;;  %p2201_p7 = por %p2200_p0, %p2199_p13 }
  0x9a   : > { %p2202_p5 = pnand %p2201_p7, %p2195_p12 }
  0x9c   : > { %2205 = shalt.err (!%p2202_p5)
}
  0x9d   : > { %s2206_s12 = scalar_lea.vmem %s2614_s11, 64  ;;  %s2357_s23 = smov [#allocation2]  }
  0x9e   : > { %p2207_p8 = scmp.ne.s32.totalorder %s2614_s11, %s2206_s12  ;;  %s2211_s18 = sshll.u32 %s2357_s23, 4  ;;  %s2212_s18 = int_to_ptr.vmem [resolvable:$false] %s2211_s18 }
  0x9f   : > { %s2213_s15 = scalar_lea.vmem %s2212_s18, 128  ;;  %p2214_p4 = scmp.lt.s32.totalorder %s2614_s11, %s2212_s18 }
  0xa0   : > { %p2209_p3 = pnand %p2207_p8, %p2193_p1  ;;  %p2215_p11 = scmp.lt.s32.totalorder %s2213_s15, %s2206_s12 }
  0xa2   : > { %p2210_p9 = pneg %p2209_p3  ;;  %p2216_p6 = por %p2215_p11, %p2214_p4 }
  0xa4   : > { %p2217_p13 = pnand %p2216_p6, %p2210_p9 }
  0xa6   : > { %2220 = shalt.err (!%p2217_p13)
}
  0xa7   : > { %2000 = dma.hbm_to_vmem [thread:$0]  (!%p2610_p10), %s2606_s13, 64, %s2614_s11, %s312_s2  }
  0xa8   : > { %s1681_s10 = sshll.u32 %s2599_s22, 3  ;;  %s1682_s9 = sshll.u32 %s2345_s28, 7 }
  0xa9   : > { %s2648_s0 = scalar_lea.hbm %s2849_s1, %s1682_s9  ;;  %s334_s12 = scalar_lea.vmem [#allocation5], %s1681_s10 }
  0xaa   : > { %s342_s18 = sshll.u32 %s334_s12, 4  ;;  %s2879_s15 = sand.u32 1, %s2349_s29   ;;  %s343_s18 = int_to_ptr.vmem [resolvable:$true] %s342_s18 }
  0xab   : > { %s331_s3 = scalar_lea.sflag [#allocation6], %s2879_s15  ;;  %s2221_s4 = scalar_lea.hbm %s2648_s0, 128 }
  0xac   : > { %p2222_p4 = scmp.ne.s32.totalorder %s2648_s0, %s2221_s4  ;;  %s2226_s13 = scalar_lea.hbm %s2849_s1, 256 }
  0xad   : > { %p2227_p0 = scmp.lt.u32.totalorder %s2648_s0, %s2849_s1  ;;  %p2228_p7 = scmp.lt.u32.totalorder %s2226_s13, %s2221_s4 }
  0xae   : > { %p2224_p9 = pnand %p2222_p4, %p2193_p1  ;;  %p2230_p8 = scmp.lt.u32.totalorder %s2221_s4, %s2648_s0 }
  0xaf   : > { %p2229_p5 = por %p2228_p7, %p2227_p0 }
  0xb0   : > { %p2225_p12 = pneg %p2224_p9 }
  0xb1   : > { %p2231_p3 = por %p2230_p8, %p2229_p5 }
  0xb3   : > { %p2232_p11 = pnand %p2231_p3, %p2225_p12 }
  0xb5   : > { %2235 = shalt.err (!%p2232_p11)
}
  0xb6   : > { %s2236_s10 = scalar_lea.vmem %s343_s18, 128  ;;  %s2358_s7 = smov [#allocation5]  }
  0xb7   : > { %p2237_p6 = scmp.ne.s32.totalorder %s343_s18, %s2236_s10  ;;  %s2241_s23 = sshll.u32 %s2358_s7, 4  ;;  %s2242_s23 = int_to_ptr.vmem [resolvable:$false] %s2241_s23 }
  0xb8   : > { %s2243_s12 = scalar_lea.vmem %s2242_s23, 256  ;;  %p2244_p9 = scmp.lt.s32.totalorder %s343_s18, %s2242_s23 }
  0xb9   : > { %p2239_p13 = pnand %p2237_p6, %p2193_p1  ;;  %p2245_p2 = scmp.lt.s32.totalorder %s2243_s12, %s2236_s10 }
  0xbb   : > { %p2240_p4 = pneg %p2239_p13  ;;  %p2246_p0 = por %p2245_p2, %p2244_p9 }
  0xbd   : > { %p2247_p7 = pnand %p2246_p0, %p2240_p4 }
  0xbf   : > { %2250 = shalt.err (!%p2247_p7)
}
  0xc0   : > { %2003 = dma.hbm_to_vmem [thread:$0]  (!%p2610_p10), %s2648_s0, 128, %s343_s18, %s331_s3  }
  0xc1   : > { %p2880_p12 = scmp.ne.s32.totalorder %s2866_s8, 0 }
  0xc2   : > { %s2674_s4 = sand.u32 (!%p2880_p12), 1, %s2333_s25   ;;  %p2881_p2 = scmp.ne.s32.totalorder (!%p2880_p12), %s2874_s14, 0 }
  0xc3   : > { %351 = sbr.rel (%p2880_p12) target bundleno = 944 (0x3b0), region = 48  ;;  %s1684_s15 = sshll.u32 (!%p2880_p12), %s2674_s4, 2 }
  0xc4   : > { %s354_s2 = scalar_lea.sflag (!%p2880_p12), [#allocation3], %s2674_s4  ;;  %s2678_s22 = scalar_lea.vmem (!%p2880_p12), [#allocation2], %s1684_s15 }
  0xca   : > { %2304 = dma.done.wait (%p2881_p2), %s354_s2, 64  }
  0xcb   : > { %2306 = vsyncadd (%p2881_p2), %s354_s2, 4294967232  ;;  %s362_s0 = sand.u32 1, %s2438_s30   ;;  %s1685_s3 = sshll.u32 %s2674_s4, 3 }
  0xcc   : > { %s363_s8 = scalar_lea.sflag [#allocation6], %s362_s0  ;;  %s2688_s16 = scalar_lea.vmem [#allocation5], %s1685_s3 }
  0xcd   : > { %2308 = dma.done.wait (%p2881_p2), %s363_s8, 128  }
  0xce   : > { %2310 = vsyncadd (%p2881_p2), %s363_s8, 4294967168  ;;  %p2882_p10 = scmp.eq.s32.totalorder %s2438_s30, 0 }
  0xd0   : > { %2312 = dma.done.wait (%p2882_p10), [#allocation6], 256   ;;  %p2883_p1 = pmov %p2882_p10 }
  0xd2   : > { %2314 = vsyncadd (%p2883_p1), [#allocation6], 4294967040  ;;  %p2884_p5 = pmov %p2883_p1 }
  0xd3   : > { %p2885_p8 = pmov %p2883_p1 }
  0xd4   : > { %2316 = dma.done.wait (%p2884_p5), [#allocation9], 4608  }
  0xd5   : > { %2318 = vsyncadd (%p2885_p8), [#allocation9], 4294962688  ;;  %p2886_p3 = pmov %p2883_p1 }
  0xd6   : > { %p2887_p11 = pmov %p2883_p1 }
  0xd7   : > { %2320 = dma.done.wait (%p2886_p3), [#allocation12], 512  }
  0xd8   : > { %2322 = vsyncadd (%p2887_p11), [#allocation12], 4294966784  ;;  %v2359_v0 = vmov 0.0|0.0   ;;  %vm2360_vm0 = vmmov 0   ;;  %v2361_v1 = vmov 0.0   ;;  %v426_v2 = vld [vmem:[#allocation7] sm:$0xff] }
  0xd9   : > { %1893 = vmatprep.subr.bf16.mxu0 %v2359_v0  ;;  %1896 = vmatprep.subr.bf16.mxu1 %v2359_v0  ;;  %v427_v3 = vld [vmem:[#allocation7 + $0x8] sm:$0xff]  ;;  %v502_v4 = vld [vmem:[#allocation8] sm:$0xff]  ;;  %v503_v6 = vld [vmem:[#allocation8 + $0x8] sm:$0xff]  ;;  %vm428_vm1 = vcmask 130048   ;;  %vm506_vm2 = vcmask 261120   ;;  %vm1308_vm3 = vcmask 1040384  }
  0xda   : > { %1769 = vmatprep.mubr.msk.f32.mxu0 %vm2360_vm0, %v2361_v1  ;;  %1780 = vmatprep.mubr.msk.f32.mxu1 %vm2360_vm0, %v2361_v1  ;;  %v1894_v5 = vpack.c.bf16 %v427_v3, %v426_v2  ;;  %v504_v7 = vld [vmem:[#allocation8 + $0x10] sm:$0xff]  ;;  %v1897_v8 = vpack.c.bf16 %v503_v6, %v502_v4  ;;  %v505_v9 = vld [vmem:[#allocation8 + $0x18] sm:$0xff]  ;;  %v651_v10 = vld [vmem:[#allocation10] sm:$0xff]  ;;  %vm1310_vm4 = vcmask 1041408   ;;  %vm1312_vm5 = vcmask 1042432   ;;  %s2364_s30 = smov 96  }
  0xdb   : > { %v652_v11 = vld [vmem:[#allocation10 + $0x8] sm:$0xff]  ;;  %v419_v12 = vld [vmem:[%s2678_s22] sm:$0xf]  ;;  %v1900_v14 = vpack.c.bf16 %v505_v9, %v504_v7  ;;  %v653_v15 = vld [vmem:[#allocation10 + $0x10] sm:$0xff]  ;;  %vm1314_vm6 = vcmask 1043456   ;;  %vm1316_vm7 = vcmask 1044480  }
  0xdc   : > { %1895 = vmatpush3.bf16.msra.mxu0 %v1894_v5  ;;  %v1903_v13 = vpack.c.bf16 %v652_v11, %v651_v10  ;;  %1898 = vmatpush3.bf16.msra.mxu1 %v1897_v8  ;;  %v654_v16 = vld [vmem:[#allocation10 + $0x18] sm:$0xff]  ;;  %v728_v17 = vld [vmem:[#allocation10 + $0x20] sm:$0xff]  ;;  %v729_v18 = vld [vmem:[#allocation10 + $0x28] sm:$0xff]  ;;  %vm1318_vm8 = vcmask 1045504   ;;  %vm1320_vm9 = vcmask 1046528   ;;  %s2365_s13 = smov 64  }
  0xdd   : > { %1902 = vmatprep.subr.bf16.mxu0 %v2359_v0  ;;  %1899 = vmatprep.subr.bf16.mxu1 %v2359_v0  ;;  %v1906_v19 = vpack.c.bf16 %v654_v16, %v653_v15  ;;  %v2718_v20 = vld [vmem:[%s2688_s16] sm:$0xff]  ;;  %v1909_v21 = vpack.c.bf16 %v729_v18, %v728_v17  ;;  %v730_v24 = vld [vmem:[#allocation10 + $0x30] sm:$0xff]  ;;  %v731_v25 = vld [vmem:[#allocation10 + $0x38] sm:$0xff]  ;;  %v2363_v16 = vmov 1983009808   ;;  %s1704_s11 = sshll.u32 %s2341_s27, 7 }
  0xde   : > { %v808_v22 = vld [vmem:[#allocation10 + $0x40] sm:$0xff]  ;;  %v809_v23 = vld [vmem:[#allocation10 + $0x48] sm:$0xff]  ;;  %v1912_v27 = vpack.c.bf16 %v731_v25, %v730_v24  ;;  %v810_v28 = vld [vmem:[#allocation10 + $0x50] sm:$0xff]  ;;  %v732_v32 = vrot.slane %v2718_v20, 1  ;;  %v812_v39 = vrot.slane %v2718_v20, 2  ;;  %v892_v46 = vrot.slane %v2718_v20, 3 }
  0xdf   : > { %1770 = vmatmul.mubr.msk.f32.vlgmr.msra.gmra.mrb[0].mxu0 %vm428_vm1, %v419_v12  ;;  %v1915_v26 = vpack.c.bf16 %v809_v23, %v808_v22  ;;  %v811_v29 = vld [vmem:[#allocation10 + $0x58] sm:$0xff]  ;;  %v888_v30 = vld [vmem:[#allocation10 + $0x60] sm:$0xff]  ;;  %v889_v31 = vld [vmem:[#allocation10 + $0x68] sm:$0xff]  ;;  %v972_v53 = vrot.slane %v2718_v20, 4  ;;  %v1052_v60 = vrot.slane %v2718_v20, 5  ;;  %v1132_v3 = vrot.slane %v2718_v20, 6 }
  0xe0   : > { %1904 = vmatpush3.bf16.msra.mxu0 %v1903_v13  ;;  %1791 = vmatprep.mubr.msk.f32.mxu0 %vm2360_vm0, %v2361_v1  ;;  %v1918_v33 = vpack.c.bf16 %v811_v29, %v810_v28  ;;  %v1921_v34 = vpack.c.bf16 %v889_v31, %v888_v30  ;;  %v968_v35 = vld [vmem:[#allocation10 + $0x80] sm:$0xff]  ;;  %v969_v36 = vld [vmem:[#allocation10 + $0x88] sm:$0xff]  ;;  %v890_v37 = vld [vmem:[#allocation10 + $0x70] sm:$0xff]  ;;  %v1212_v5 = vrot.slane %v2718_v20, 7  ;;  %v585_v12 = vlaneseq  ;;  %s417_s9 = scalar_lea.vmem [#allocation13], %s1685_s3  ;;  %s2888_s12 = sld [smem:[#allocation24_spill]] }
  0xe1   : > { %1901 = vmatpush3.bf16.msra.mxu1 %v1900_v14  ;;  %1905 = vmatprep.subr.bf16.mxu0 %v2359_v0  ;;  %v891_v38 = vld [vmem:[#allocation10 + $0x78] sm:$0xff]  ;;  %v1927_v40 = vpack.c.bf16 %v969_v36, %v968_v35  ;;  %v970_v42 = vld [vmem:[#allocation10 + $0x90] sm:$0xff]  ;;  %v1048_v44 = vld [vmem:[#allocation10 + $0xa0] sm:$0xff]  ;;  %v2362_v13 = vmov 1966171168   ;;  %v583_v17 = vunpack.c.l.s4 %v2363_v16  ;;  %s1527_s10 = sshll.u32 %s417_s9, 4  ;;  %s2801_s10 = int_to_ptr.vmem [resolvable:$true] %s1527_s10 }
  0xe2   : > { %1908 = vmatprep.subr.bf16.mxu1 %v2359_v0  ;;  %v1924_v41 = vpack.c.bf16 %v891_v38, %v890_v37  ;;  %v971_v43 = vld [vmem:[#allocation10 + $0x98] sm:$0xff]  ;;  %v1049_v45 = vld [vmem:[#allocation10 + $0xa8] sm:$0xff]  ;;  %v1128_v49 = vld [vmem:[#allocation10 + $0xc0] sm:$0xff]  ;;  %v604_v14 = vunpack.c.l.s4 %v2362_v13  ;;  %v2775_v15 = vshrl.u32 %v585_v12, 7  ;;  %vm1509_vm10 = vcmask 523264   ;;  %s1513_s2 = scalar_lea.sflag [#allocation4], %s2674_s4 }
  0xe3   : > { %v1930_v47 = vpack.c.bf16 %v971_v43, %v970_v42  ;;  %v1933_v48 = vpack.c.bf16 %v1049_v45, %v1048_v44  ;;  %v1129_v50 = vld [vmem:[#allocation10 + $0xc8] sm:$0xff]  ;;  %v1050_v51 = vld [vmem:[#allocation10 + $0xb0] sm:$0xff]  ;;  %v1051_v52 = vld [vmem:[#allocation10 + $0xb8] sm:$0xff]  ;;  %s2251_s27 = scalar_lea.vmem %s2801_s10, 128  ;;  %p2889_p13 = scmp.ne.s32.totalorder %s2875_s17, 0 }
  0xe4   : > { %1781 = vmatmul.mubr.msk.f32.vlgmr.msra.gmra.mrb[0].mxu1 %vm506_vm2, %v2718_v20  ;;  %1907 = vmatpush3.bf16.msra.mxu0 %v1906_v19  ;;  %v1939_v54 = vpack.c.bf16 %v1129_v50, %v1128_v49  ;;  %v1936_v55 = vpack.c.bf16 %v1051_v52, %v1050_v51  ;;  %v1130_v56 = vld [vmem:[#allocation10 + $0xd0] sm:$0xff]  ;;  %v1131_v57 = vld [vmem:[#allocation10 + $0xd8] sm:$0xff]  ;;  %v1208_v58 = vld [vmem:[#allocation10 + $0xe0] sm:$0xff]  ;;  %v584_v19 = vunpack.c.0.s8 %v583_v17  ;;  %v2779_v22 = vsub.s32 0, %v2775_v15  ;;  %p2252_p6 = scmp.ne.s32.totalorder %s2801_s10, %s2251_s27  ;;  %s2366_s22 = smov [#allocation13]  }
  0xe5   : > { %1910 = vmatpush3.bf16.msra.mxu1 %v1909_v21  ;;  %1914 = vmatprep.subr.bf16.mxu0 %v2359_v0  ;;  %v1209_v59 = vld [vmem:[#allocation10 + $0xe8] sm:$0xff]  ;;  %v1942_v61 = vpack.c.bf16 %v1131_v57, %v1130_v56  ;;  %v1210_v63 = vld [vmem:[#allocation10 + $0xf0] sm:$0xff]  ;;  %v1211_v2 = vld [vmem:[#allocation10 + $0xf8] sm:$0xff]  ;;  %s2255_s0 = sshll.u32 %s2366_s22, 4  ;;  %s2256_s0 = int_to_ptr.vmem [resolvable:$false] %s2255_s0 }
  0xe6   : > { %1911 = vmatprep.subr.bf16.mxu1 %v2359_v0  ;;  %1802 = vmatprep.mubr.msk.f32.mxu1 %vm2360_vm0, %v2361_v1  ;;  %v1945_v62 = vpack.c.bf16 %v1209_v59, %v1208_v58  ;;  %v1948_v4 = vpack.c.bf16 %v1211_v2, %v1210_v63  ;;  %v421_v6 = vld [vmem:[#allocation11] sm:$0xff]  ;;  %v422_v7 = vld [vmem:[#allocation11 + $0x8] sm:$0xff]  ;;  %v423_v9 = vld [vmem:[#allocation11 + $0x10] sm:$0xff]  ;;  %v587_v23 = vsub.s32 %v584_v19, %v2775_v15  ;;  %s2799_s15 = scalar_lea.hbm %s2888_s12, %s1704_s11  ;;  %p2253_p4 = pnand %p2252_p6, %p2889_p13 }
  0xe7   : > { %1792 = vmatmul.mubr.msk.f32.vlgmr.msra.gmra.mrb[2].mxu0 %vm506_vm2, %v2718_v20  ;;  %v1951_v8 = vpack.c.bf16 %v422_v7, %v421_v6  ;;  %v424_v10 = vld [vmem:[#allocation11 + $0x18] sm:$0xff]  ;;  %s2257_s3 = scalar_lea.vmem %s2256_s0, 256  ;;  %p2258_p0 = scmp.lt.s32.totalorder %s2801_s10, %s2256_s0 }
  0xe8   : > { %1916 = vmatpush3.bf16.msra.mxu0 %v1915_v26  ;;  %1813 = vmatprep.mubr.msk.f32.mxu0 %vm2360_vm0, %v2361_v1  ;;  %v1954_v11 = vpack.c.bf16 %v424_v10, %v423_v9  ;;  %p2254_p9 = pneg %p2253_p4  ;;  %p2259_p7 = scmp.lt.s32.totalorder %s2257_s3, %s2251_s27 }
  0xe9   : > { %1913 = vmatpush3.bf16.msra.mxu1 %v1912_v27  ;;  %1917 = vmatprep.subr.bf16.mxu0 %v2359_v0 }
  0xea   : > { %1920 = vmatprep.subr.bf16.mxu1 %v2359_v0  ;;  %p2260_p12 = por %p2259_p7, %p2258_p0 }
  0xec   : > { %1803 = vmatmul.mubr.msk.f32.vlgmr.msra.gmra.mrb[2].mxu1 %vm506_vm2, %v732_v32  ;;  %1919 = vmatpush3.bf16.msra.mxu0 %v1918_v33  ;;  %p2261_p2 = pnand %p2260_p12, %p2254_p9 }
  0xed   : > { %1922 = vmatpush3.bf16.msra.mxu1 %v1921_v34  ;;  %1926 = vmatprep.subr.bf16.mxu0 %v2359_v0 }
  0xee   : > { %1923 = vmatprep.subr.bf16.mxu1 %v2359_v0  ;;  %1824 = vmatprep.mubr.msk.f32.mxu1 %vm2360_vm0, %v2361_v1 }
  0xef   : > { %1814 = vmatmul.mubr.msk.f32.vlgmr.msra.gmra.mrb[4].mxu0 %vm506_vm2, %v812_v39 }
  0xf0   : > { %1928 = vmatpush3.bf16.msra.mxu0 %v1927_v40  ;;  %1835 = vmatprep.mubr.msk.f32.mxu0 %vm2360_vm0, %v2361_v1 }
  0xf1   : > { %1925 = vmatpush3.bf16.msra.mxu1 %v1924_v41  ;;  %1929 = vmatprep.subr.bf16.mxu0 %v2359_v0 }
  0xf2   : > { %1932 = vmatprep.subr.bf16.mxu1 %v2359_v0 }
  0xf4   : > { %1825 = vmatmul.mubr.msk.f32.vlgmr.msra.gmra.mrb[4].mxu1 %vm506_vm2, %v892_v46  ;;  %1931 = vmatpush3.bf16.msra.mxu0 %v1930_v47 }
  0xf5   : > { %1934 = vmatpush3.bf16.msra.mxu1 %v1933_v48  ;;  %1938 = vmatprep.subr.bf16.mxu0 %v2359_v0 }
  0xf6   : > { %1935 = vmatprep.subr.bf16.mxu1 %v2359_v0  ;;  %1846 = vmatprep.mubr.msk.f32.mxu1 %vm2360_vm0, %v2361_v1 }
  0xf7   : > { %1836 = vmatmul.mubr.msk.f32.vlgmr.msra.gmra.mrb[6].mxu0 %vm506_vm2, %v972_v53 }
  0xf8   : > { %1940 = vmatpush3.bf16.msra.mxu0 %v1939_v54  ;;  %1857 = vmatprep.mubr.msk.f32.mxu0 %vm2360_vm0, %v2361_v1 }
  0xf9   : > { %1937 = vmatpush3.bf16.msra.mxu1 %v1936_v55  ;;  %1941 = vmatprep.subr.bf16.mxu0 %v2359_v0 }
  0xfa   : > { %1944 = vmatprep.subr.bf16.mxu1 %v2359_v0 }
  0xfc   : > { %1847 = vmatmul.mubr.msk.f32.vlgmr.msra.gmra.mrb[6].mxu1 %vm506_vm2, %v1052_v60  ;;  %1943 = vmatpush3.bf16.msra.mxu0 %v1942_v61 }
  0xfd   : > { %1946 = vmatpush3.bf16.msra.mxu1 %v1945_v62  ;;  %1868 = vmatprep.mubr.msk.f32.mxu1 %vm2360_vm0, %v2361_v1 }
  0xfe   : > { %1947 = vmatprep.subr.bf16.mxu1 %v2359_v0  ;;  %1950 = vmatprep.subr.bf16.mxu0 %v2359_v0 }
  0xff   : > { %1858 = vmatmul.mubr.msk.f32.vlgmr.msra.gmra.mrb[8].mxu0 %vm506_vm2, %v1132_v3 }
 0x100   : > { %1879 = vmatprep.mubr.msk.f32.mxu0 %vm2360_vm0, %v2361_v1  ;;  %1952 = vmatpush3.bf16.msra.mxu0 %v1951_v8 }
 0x101   : > { %1949 = vmatpush3.bf16.msra.mxu1 %v1948_v4  ;;  %1953 = vmatprep.subr.bf16.mxu0 %v2359_v0 }
 0x102   : > { %1956 = vmatprep.subr.bf16.mxu1 %v2359_v0 }
 0x104   : > { %1869 = vmatmul.mubr.msk.f32.vlgmr.msra.gmra.mrb[8].mxu1 %vm506_vm2, %v1212_v5  ;;  %1955 = vmatpush3.bf16.msra.mxu0 %v1954_v11 }
 0x105   : > { %1890 = vmatprep.mubr.msk.f32.mxu1 %vm2360_vm0, %v2361_v1  ;;  %1958 = vmatpush3.bf16.msra.mxu1 %v1951_v8  ;;  %v605_v1 = vunpack.c.0.s8 %v604_v14 }
 0x106   : > { %1959 = vmatprep.subr.bf16.mxu1 %v2359_v0 }
 0x107   : > { %v608_v18 = vsub.s32 %v605_v1, %v2775_v15 }
 0x109   : > { %1961 = vmatpush3.bf16.msra.mxu1 %v1954_v11 }
 0x1b2   : > { %v498_v20 = vpop.f32.mrb[0].mxu0 }
 0x1b3   : > { %v609_v21 = vrot.slane %v498_v20, %v608_v18  ;;  %v1771_v0 = vpop.f32.mrb[1].mxu0 }
 0x1b5   : > { %v610_v24 = vcombine.high %v609_v21, %v609_v21  ;;  %v617_v25 = vrot.slane %v609_v21, %v608_v18 }
 0x1b7   : > { %v624_v26 = vrot.slane %v610_v24, %v608_v18  ;;  %v625_v27 = vcombine.high %v617_v25, %v617_v25  ;;  %v630_v28 = vrot.slane %v617_v25, %v2779_v22  ;;  %v576_v29 = vpop.f32.mrb[0].mxu1 }
 0x1b8   : > { %v581_v30 = vcombine.high %v576_v29, %v576_v29  ;;  %v588_v31 = vrot.slane %v576_v29, %v587_v23  ;;  %v1782_v32 = vpop.f32.mrb[1].mxu1 }
 0x1b9   : > { %v626_v33 = vcombine.high %v624_v26, %v624_v26  ;;  %v634_v34 = vrot.slane %v624_v26, %v2779_v22  ;;  %v638_v35 = vrot.slane %v625_v27, %v2779_v22 }
 0x1ba   : > { %v595_v36 = vrot.slane %v581_v30, %v587_v23  ;;  %v596_v37 = vcombine.high %v588_v31, %v588_v31  ;;  %v647_v38 = vadd.f32 %v630_v28, %v588_v31  ;;  %v721_v39 = vpop.f32.mrb[2].mxu0 }
 0x1bb   : > { %v642_v40 = vrot.slane %v626_v33, %v2779_v22  ;;  %v1793_v41 = vpop.f32.mrb[3].mxu0  ;;  %v725_v48 = vmul.f32 0.2, %v721_v39 }
 0x1bc   : > { %v597_v42 = vcombine.high %v595_v36, %v595_v36  ;;  %v648_v43 = vadd.f32 %v634_v34, %v596_v37  ;;  %v649_v44 = vadd.f32 %v638_v35, %v595_v36  ;;  %v1500_v36 = vsub.s32 1, %v2775_v15  ;;  %v425_v37 = vld [vmem:[%s2854_s6] sm:$0x3] }
 0x1bd   : > { %v726_v58 = vmax.f32 %v721_v39, %v725_v48 }
 0x1be   : > { %v650_v45 = vadd.f32 %v642_v40, %v597_v42  ;;  %v1326_v46 = vcombine.low %v647_v38, %v648_v43  ;;  %v1501_v38 = vrot.slane %v425_v37, %v1500_v36 }
 0x1bf   : > { %v801_v47 = vpop.f32.mrb[2].mxu1 }
 0x1c0   : > { %v805_v49 = vmul.f32 0.2, %v801_v47  ;;  %v1804_v50 = vpop.f32.mrb[3].mxu1  ;;  %v1327_v51 = vcombine.low %v649_v44, %v650_v45  ;;  %v1334_v54 = vrot.slane %v1326_v46, %v587_v23  ;;  %v1420_v46 = vrot.slane %v425_v37, %v2779_v22 }
 0x1c2   : > { %v806_v52 = vmax.f32 %v801_v47, %v805_v49  ;;  %v881_v53 = vpop.f32.mrb[4].mxu0  ;;  %v1341_v55 = vrot.slane %v1327_v51, %v587_v23 }
 0x1c3   : > { %v885_v56 = vmul.f32 0.2, %v881_v53  ;;  %v1815_v57 = vpop.f32.mrb[5].mxu0 }
 0x1c4   : > { %v1288_v59 = vrot.slane %v806_v52, 7  ;;  %v1342_v60 = vcombine.low %v1334_v54, %v1341_v55 }
 0x1c5   : > { %v886_v61 = vmax.f32 %v881_v53, %v885_v56 }
 0x1c6   : > { %v1309_v62 = vsel %vm1308_vm3, %v726_v58, %v1288_v59 }
 0x1c7   : > { %v1291_v63 = vrot.slane %v886_v61, 6  ;;  %v961_v2 = vpop.f32.mrb[4].mxu1 }
 0x1c8   : > { %v965_v3 = vmul.f32 0.2, %v961_v2  ;;  %v1826_v4 = vpop.f32.mrb[5].mxu1 }
 0x1c9   : > { %v1311_v5 = vsel %vm1310_vm4, %v1309_v62, %v1291_v63 }
 0x1ca   : > { %v966_v6 = vmax.f32 %v961_v2, %v965_v3  ;;  %v1041_v7 = vpop.f32.mrb[6].mxu0 }
 0x1cb   : > { %v1045_v8 = vmul.f32 0.2, %v1041_v7  ;;  %v1837_v9 = vpop.f32.mrb[7].mxu0 }
 0x1cc   : > { %v1294_v10 = vrot.slane %v966_v6, 5 }
 0x1cd   : > { %v1046_v11 = vmax.f32 %v1041_v7, %v1045_v8 }
 0x1ce   : > { %v1313_v12 = vsel %vm1312_vm5, %v1311_v5, %v1294_v10 }
 0x1cf   : > { %v1297_v13 = vrot.slane %v1046_v11, 4  ;;  %v1121_v14 = vpop.f32.mrb[6].mxu1 }
 0x1d0   : > { %v1125_v1 = vmul.f32 0.2, %v1121_v14  ;;  %v1848_v16 = vpop.f32.mrb[7].mxu1 }
 0x1d1   : > { %v1315_v17 = vsel %vm1314_vm6, %v1313_v12, %v1297_v13 }
 0x1d2   : > { %v1126_v18 = vmax.f32 %v1121_v14, %v1125_v1  ;;  %v1201_v19 = vpop.f32.mrb[8].mxu0 }
 0x1d3   : > { %v1205_v20 = vmul.f32 0.2, %v1201_v19  ;;  %v1859_v21 = vpop.f32.mrb[9].mxu0 }
 0x1d4   : > { %v1300_v0 = vrot.slane %v1126_v18, 3 }
 0x1d5   : > { %v1206_v23 = vmax.f32 %v1201_v19, %v1205_v20 }
 0x1d6   : > { %v1317_v24 = vsel %vm1316_vm7, %v1315_v17, %v1300_v0 }
 0x1d7   : > { %v1303_v25 = vrot.slane %v1206_v23, 2  ;;  %v1281_v26 = vpop.f32.mrb[8].mxu1 }
 0x1d8   : > { %v1285_v27 = vmul.f32 0.2, %v1281_v26  ;;  %v1870_v28 = vpop.f32.mrb[9].mxu1 }
 0x1d9   : > { %v1319_v29 = vsel %vm1318_vm8, %v1317_v24, %v1303_v25 }
 0x1da   : > { %v1286_v30 = vmax.f32 %v1281_v26, %v1285_v27 }
 0x1dc   : > { %v1306_v31 = vrot.slane %v1286_v30, 1 }
 0x1de   : > { %v1321_v32 = vsel %vm1320_vm9, %v1319_v29, %v1306_v31 }
 0x1df   : > { %1424 = vrot.lane.b32.xlu0 %v1321_v32, %s2364_s30  ;;  %1880 = vmatmul.mubr.msk.f32.vlgmr.msra.gmra.mrb[10].mxu0 %vm506_vm2, %v1321_v32 }
 0x251   : > { %v1425_v33 = vpop.permute.xlu0 %1424 }
 0x252   : > { %1891 = vmatmul.mubr.msk.f32.vlgmr.msra.gmra.mrb[10].mxu1 %vm506_vm2, %v1425_v33 }
 0x2b2   : > { %v1413_v34 = vpop.f32.mrb[10].mxu0 }
 0x2b3   : > { %v1881_v35 = vpop.f32.mrb[11].mxu0  ;;  %v1414_v45 = vadd.f32 %v1413_v34, %v1342_v60 }
 0x2b5   : > { %v1421_v15 = vadd.f32 %v1420_v46, %v1414_v45 }
 0x2b7   : > { %v1422_v47 = vmul.f32 0.2, %v1421_v15 }
 0x2b9   : > { %v1423_v48 = vmax.f32 %v1421_v15, %v1422_v47 }
 0x325   : > { %v1494_v39 = vpop.f32.mrb[10].mxu1 }
 0x326   : > { %v1495_v40 = vadd.f32 %v1494_v39, %v1342_v60  ;;  %v1892_v41 = vpop.f32.mrb[11].mxu1 }
 0x328   : > { %v1502_v42 = vadd.f32 %v1501_v38, %v1495_v40 }
 0x32a   : > { %v1503_v43 = vmul.f32 0.2, %v1502_v42 }
 0x32c   : > { %v1504_v44 = vmax.f32 %v1502_v42, %v1503_v43 }
 0x32e   : > { %1506 = vrot.lane.b32.xlu0 %v1504_v44, %s2365_s13 }
 0x3a0   : > { %v1507_v49 = vpop.permute.xlu0 %1506 }
 0x3a1   : > { %v1510_v22 = vsel %vm1509_vm10, %v1423_v48, %v1507_v49 }
 0x3a2   : > { %1511 = vst [vmem:[%s417_s9] sm:$0xff] %v1510_v22 }
 0x3a3   : > { %2264 = shalt.err (!%p2261_p2)
}
 0x3a4   : > { %s2265_s4 = scalar_lea.hbm %s2799_s15, 128  ;;  %s2269_s30 = scalar_lea.hbm %s2888_s12, 256 }
 0x3a5   : > { %p2266_p10 = scmp.ne.s32.totalorder %s2799_s15, %s2265_s4  ;;  %p2270_p8 = scmp.lt.u32.totalorder %s2799_s15, %s2888_s12 }
 0x3a6   : > { %p2271_p3 = scmp.lt.u32.totalorder %s2269_s30, %s2265_s4  ;;  %p2273_p6 = scmp.lt.u32.totalorder %s2265_s4, %s2799_s15 }
 0x3a7   : > { %p2267_p1 = pnand %p2266_p10, %p2889_p13 }
 0x3a8   : > { %p2272_p11 = por %p2271_p3, %p2270_p8 }
 0x3a9   : > { %p2268_p5 = pneg %p2267_p1 }
 0x3aa   : > { %p2274_p4 = por %p2273_p6, %p2272_p11 }
 0x3ac   : > { %p2275_p9 = pnand %p2274_p4, %p2268_p5 }
 0x3ae   : > { %2278 = shalt.err (!%p2275_p9)
}
 0x3af   : > { %1982 = dma.vmem_to_hbm [thread:$0]  (%p2889_p13), %s2801_s10, 128, %s2799_s15, %s1513_s2  }
 0x3b0 PF: > { %s1539_s13 = sand.u32 1, %s2329_s24   ;;  %p2890_p0 = scmp.ne.s32.totalorder %s2876_s20, 0 }
 0x3b1   : > { %p2891_p7 = scmp.ge.s32.totalorder %s2349_s29, 2  ;;  %s1540_s11 = scalar_lea.sflag [#allocation4], %s1539_s13 }
 0x3b3   : > { %p2005_p12 = pnand %p2891_p7, %p2890_p0 }
 0x3b5   : > { %2324 = dma.done.wait (!%p2005_p12), %s1540_s11, 128  }
 0x3b6   : > { %2326 = vsyncadd (!%p2005_p12), %s1540_s11, 4294967168  ;;  %s28_s29 = sadd.s32 1, %s2349_s29   ;;  %s2892_s24 = smov %s2333_s25 }
 0x3b7   : > { %p25_p2 = scmp.ge.s32.totalorder %s28_s29, 4   ;;  %s2893_s25 = smov %s2337_s26 }
 0x3b8   : > { %s2894_s26 = smov %s2591_s19  ;;  %s2895_s27 = smov %s2345_s28 }
 0x3b9   : > { %s2896_s28 = smov %s2898_s21  ;;  %27 = sbr.rel (!%p25_p2) target bundleno = 16 (0x10), region = 130 }
 0x3c0   :  { %1545 = vsyncpa [#allocation3], 1 }
 0x3c1   :  { %1547 = vsyncpa [#allocation3 + $0x1], 1 }
 0x3c2   :  { %1548 = vsyncpa [#allocation6], 1 }
 0x3c3   :  { %1550 = vsyncpa [#allocation6 + $0x1], 1 }
 0x3c4   :  { %1551 = vsyncpa [#allocation9], 1 }
 0x3c5   :  { %1552 = vsyncpa [#allocation12], 1 }
 0x3c6   :  { %1553 = vsyncpa [#allocation4], 1 }
 0x3c7   :  { %1555 = vsyncpa [#allocation4 + $0x1], 1 }

// kernel: tpu_custom_call.1
= control target key start
LH: loop header
LB: loop body
LE: loop exit
PB: predicated region body
PF: predicated region fallthrough
CT: control target
= control target key end

     0   :  { %s2848_s0 = inlined_call_operand.hbm [shape: f32[2,4,16], index: 0, kind: input, shape index: {}]   ;;  %s2849_s1 = inlined_call_operand.hbm [shape: f32[2,8,32], index: 1, kind: input, shape index: {}]   ;;  %s2850_s2 = inlined_call_operand.hbm [shape: f32[16,64], index: 2, kind: input, shape index: {}]   ;;  %s2851_s3 = inlined_call_operand.hbm [shape: f32[32,64], index: 3, kind: input, shape index: {}]   ;;  %s2852_s4 = inlined_call_operand.hbm [shape: f32[8,32,64], index: 4, kind: input, shape index: {}]   ;;  %s2853_s5 = inlined_call_operand.hbm [shape: f32[32,64], index: 5, kind: input, shape index: {}]   ;;  %s2854_s6 = inlined_call_operand.vmem [shape: f32[1,2,64], index: 6, kind: input, shape index: {}]   ;;  %s2855_s7 = inlined_call_operand.hbm [shape: f32[2,8,128], index: 7, kind: output, shape index: {}]  }
   0x1   :  { %2861 = sst [smem:[#allocation20_spill]] %s2848_s0 }
   0x2   :  { %2862 = sst [smem:[#allocation21_spill]] %s2850_s2 }
   0x3   :  { %2863 = sst [smem:[#allocation22_spill]] %s2851_s3 }
   0x4   :  { %2864 = sst [smem:[#allocation23_spill]] %s2852_s4 }
   0x5   :  { %2865 = sst [smem:[#allocation24_spill]] %s2855_s7 }
   0x6   :  { %12 = vsyncpa [#allocation3], 0 }
   0x7   :  { %14 = vsyncpa [#allocation3 + $0x1], 0 }
   0x8   :  { %15 = vsyncpa [#allocation6], 0 }
   0x9   :  { %17 = vsyncpa [#allocation6 + $0x1], 0 }
   0xa   :  { %18 = vsyncpa [#allocation9], 0 }
   0xb   :  { %19 = vsyncpa [#allocation12], 0 }
   0xc   :  { %20 = vsyncpa [#allocation4], 0 }
   0xd   :  { %22 = vsyncpa [#allocation4 + $0x1], 0  ;;  %s2407_s24 = smov 0   ;;  %s2409_s25 = smov 0  }
   0xe   :  { %s2411_s26 = smov 0   ;;  %s2413_s27 = smov 0  }
   0xf   :  { %s2415_s28 = smov 0   ;;  %s2417_s29 = smov 0  }
  0x10 LB: > { %s2438_s30 = sadd.s32 4294967295, %s2349_s29   ;;  %p1673_p0 = scmp.ge.s32.totalorder %s2349_s29, 1  ;;  %s2349_s29 = sphi %s2417_s29, %s28_s29   ;;  %s2345_s28 = sphi %s2415_s28, %s2896_s28   ;;  %s2341_s27 = sphi %s2413_s27, %s2895_s27   ;;  %s2337_s26 = sphi %s2411_s26, %s2894_s26   ;;  %s2333_s25 = sphi %s2409_s25, %s2893_s25   ;;  %s2329_s24 = sphi %s2407_s24, %s2892_s24  }
  0x11   : > { %p2857_p1 = scmp.eq.s32.totalorder %s2438_s30, 0  ;;  %p239_p2 = scmp.lt.s32.totalorder %s2349_s29, 3 }
  0x12   : > { %s2351_s9 = smov [#allocation7]   ;;  %s2352_s12 = smov [#allocation8]  }
  0x13   : > { %p2443_p3 = pnand %p1673_p0, %p239_p2  ;;  %s251_s10 = sshll.u32 %s2351_s9, 4  ;;  %s2447_s10 = int_to_ptr.vmem [resolvable:$true] %s251_s10 }
  0x14   : > { %s264_s13 = sshll.u32 %s2352_s12, 4  ;;  %s2353_s14 = smov [#allocation10]   ;;  %s2458_s13 = int_to_ptr.vmem [resolvable:$true] %s264_s13 }
  0x15   : > { %s2866_s8 = scalar_select %p2443_p3, 1, 0 }
  0x16   : > { %p1984_p4 = pneg %p2443_p3  ;;  %s2460_s15 = sshll.u32 %s2353_s14, 4  ;;  %s282_s15 = int_to_ptr.vmem [resolvable:$true] %s2460_s15 }
  0x17   : > { %s2868_s2 = sld [smem:[#allocation21_spill]] }
  0x18   : > { %p2454_p6 = pnand %p1984_p4, %p2857_p1 }
  0x1a   : > { %p2470_p8 = pneg %p2454_p6 }
  0x1d   : > { %s2079_s18 = scalar_lea.hbm %s2868_s2, 256 }
  0x1e   : > { %p2080_p7 = scmp.ne.s32.totalorder %s2868_s2, %s2079_s18  ;;  %p2086_p11 = scmp.lt.u32.totalorder %s2079_s18, %s2868_s2 }
  0x20   : > { %p2082_p9 = pnand %p2470_p8, %p2080_p7 }
  0x22   : > { %p2083_p10 = pneg %p2082_p9 }
  0x24   : > { %p2088_p12 = pnand %p2086_p11, %p2083_p10 }
  0x26   : > { %2091 = shalt.err (!%p2088_p12)
}
  0x27   : > { %s2092_s9 = scalar_lea.vmem %s2447_s10, 256  ;;  %p2100_p4 = scmp.lt.s32.totalorder %s2447_s10, %s2447_s10 }
  0x28   : > { %p2093_p13 = scmp.ne.s32.totalorder %s2447_s10, %s2092_s9  ;;  %p2101_p5 = scmp.lt.s32.totalorder %s2092_s9, %s2092_s9 }
  0x2a   : > { %p2095_p0 = pnand %p2093_p13, %p2470_p8  ;;  %p2102_p7 = por %p2101_p5, %p2100_p4 }
  0x2c   : > { %p2096_p2 = pneg %p2095_p0 }
  0x2e   : > { %p2103_p9 = pnand %p2102_p7, %p2096_p2 }
  0x30   : > { %2106 = shalt.err (!%p2103_p9)
}
  0x31   : > { %s2354_s12 = smov 128   ;;  %s2355_s14 = smov 8  }
  0x32   : > { %1987 = dma.hbm_to_vmem [thread:$0]  (!%p2454_p6), %s2868_s2, 256, %s2447_s10, [#allocation6], %s2354_s12, %s2354_s12, %s2355_s14  }
  0x33   : > { %s2870_s3 = sld [smem:[#allocation22_spill]] }
  0x39   : > { %s2107_s20 = scalar_lea.hbm %s2870_s3, 512 }
  0x3a   : > { %p2108_p5 = scmp.ne.s32.totalorder %s2870_s3, %s2107_s20  ;;  %p2114_p12 = scmp.lt.u32.totalorder %s2107_s20, %s2870_s3 }
  0x3c   : > { %p2110_p10 = pnand %p2108_p5, %p2470_p8 }
  0x3e   : > { %p2111_p11 = pneg %p2110_p10 }
  0x40   : > { %p2116_p13 = pnand %p2114_p12, %p2111_p11 }
  0x42   : > { %2119 = shalt.err (!%p2116_p13)
}
  0x43   : > { %s2120_s10 = scalar_lea.vmem %s2458_s13, 512  ;;  %p2128_p7 = scmp.lt.s32.totalorder %s2458_s13, %s2458_s13 }
  0x44   : > { %p2121_p0 = scmp.ne.s32.totalorder %s2458_s13, %s2120_s10  ;;  %p2129_p9 = scmp.lt.s32.totalorder %s2120_s10, %s2120_s10 }
  0x46   : > { %p2123_p2 = pnand %p2121_p0, %p2470_p8  ;;  %p2130_p5 = por %p2129_p9, %p2128_p7 }
  0x48   : > { %p2124_p4 = pneg %p2123_p2 }
  0x4a   : > { %p2131_p10 = pnand %p2130_p5, %p2124_p4 }
  0x4c   : > { %2134 = shalt.err (!%p2131_p10)
}
  0x4d   : > { %1990 = dma.hbm_to_vmem [thread:$0]  (!%p2454_p6), %s2870_s3, 512, %s2458_s13, [#allocation9], %s2354_s12, %s2354_s12, %s2355_s14  }
  0x4e   : > { %s2871_s4 = sld [smem:[#allocation23_spill]] }
  0x54   : > { %s2135_s19 = scalar_lea.hbm %s2871_s4, 4096 }
  0x55   : > { %p2136_p11 = scmp.ne.s32.totalorder %s2871_s4, %s2135_s19  ;;  %p2142_p0 = scmp.lt.u32.totalorder %s2135_s19, %s2871_s4 }
  0x57   : > { %p2138_p12 = pnand %p2136_p11, %p2470_p8 }
  0x59   : > { %p2139_p13 = pneg %p2138_p12 }
  0x5b   : > { %p2144_p2 = pnand %p2142_p0, %p2139_p13 }
  0x5d   : > { %2147 = shalt.err (!%p2144_p2)
}
  0x5e   : > { %s2148_s10 = scalar_lea.vmem %s282_s15, 4096  ;;  %p2156_p5 = scmp.lt.s32.totalorder %s282_s15, %s282_s15 }
  0x5f   : > { %p2149_p4 = scmp.ne.s32.totalorder %s282_s15, %s2148_s10  ;;  %p2157_p10 = scmp.lt.s32.totalorder %s2148_s10, %s2148_s10 }
  0x61   : > { %p2151_p7 = pnand %p2149_p4, %p2470_p8  ;;  %p2158_p1 = por %p2157_p10, %p2156_p5 }
  0x63   : > { %p2152_p9 = pneg %p2151_p7 }
  0x65   : > { %p2159_p3 = pnand %p2158_p1, %p2152_p9 }
  0x67   : > { %2162 = shalt.err (!%p2159_p3)
}
  0x68   : > { %1993 = dma.hbm_to_vmem [thread:$0]  (!%p2454_p6), %s2871_s4, 4096, %s282_s15, [#allocation9], %s2354_s12, %s2354_s12, %s2355_s14  }
  0x69   : > { %s2356_s16 = smov [#allocation11]   ;;  %s2163_s20 = scalar_lea.hbm %s2853_s5, 512 }
  0x6a   : > { %s294_s17 = sshll.u32 %s2356_s16, 4  ;;  %p2164_p1 = scmp.ne.s32.totalorder %s2853_s5, %s2163_s20  ;;  %s295_s17 = int_to_ptr.vmem [resolvable:$true] %s294_s17 }
  0x6b   : > { %p2170_p12 = scmp.lt.u32.totalorder %s2163_s20, %s2853_s5 }
  0x6c   : > { %p2166_p3 = pnand %p2164_p1, %p2470_p8 }
  0x6e   : > { %p2167_p11 = pneg %p2166_p3 }
  0x70   : > { %p2172_p13 = pnand %p2170_p12, %p2167_p11 }
  0x72   : > { %2175 = shalt.err (!%p2172_p13)
}
  0x73   : > { %s2176_s15 = scalar_lea.vmem %s295_s17, 512  ;;  %p2184_p7 = scmp.lt.s32.totalorder %s295_s17, %s295_s17 }
  0x74   : > { %p2177_p0 = scmp.ne.s32.totalorder %s295_s17, %s2176_s15  ;;  %p2185_p9 = scmp.lt.s32.totalorder %s2176_s15, %s2176_s15 }
  0x76   : > { %p2179_p2 = pnand %p2177_p0, %p2470_p8  ;;  %p2186_p5 = por %p2185_p9, %p2184_p7 }
  0x78   : > { %p2180_p4 = pneg %p2179_p2 }
  0x7a   : > { %p2187_p10 = pnand %p2186_p5, %p2180_p4 }
  0x7c   : > { %2190 = shalt.err (!%p2187_p10)
}
  0x7d   : > { %1996 = dma.hbm_to_vmem [thread:$0]  (!%p2454_p6), %s2853_s5, 512, %s295_s17, [#allocation12], %s2354_s12, %s2354_s12, %s2355_s14  }
  0x7e   : > { %s1672_s11 = sadd.s32 4294967294, %s2349_s29   ;;  %s40_s21 = sadd.s32 1, %s2345_s28 }
  0x7f   : > { %p42_p8 = scmp.ge.s32.totalorder %s40_s21, 2  ;;  %s49_s16 = sadd.s32 1, %s2337_s26 }
  0x80   : > { %p56_p1 = scmp.ne.s32.totalorder %s2337_s26, %s2333_s25  ;;  %p57_p3 = scmp.eq.s32.totalorder %s2349_s29, 0 }
  0x81   : > { %s2898_s21 = smov (%p42_p8, %s40_s21), 0  ;;  %p62_p12 = scmp.ne.s32.totalorder %s2333_s25, %s2329_s24 }
  0x82   : > { %p2571_p11 = por %p57_p3, %p56_p1  ;;  %s44_s12 = ssub.s32 %s2345_s28, %s2898_s21 }
  0x83   : > { %p226_p6 = scmp.eq.s32.totalorder %s2438_s30, 1  ;;  %p47_p13 = scmp.eq.s32.totalorder %s44_s12, 0 }
  0x84   : > { %p2873_p0 = scmp.eq.s32.totalorder %s2438_s30, 0  ;;  %p232_p7 = scmp.eq.s32.totalorder %s1672_s11, 1 }
  0x85   : > { %p2586_p4 = por %p226_p6, %p56_p1  ;;  %p2012_p5 = scmp.lt.s32.totalorder %s2349_s29, 2 }
  0x86   : > { %p2582_p2 = por %p2873_p0, %p62_p12  ;;  %p2593_p9 = por %p232_p7, %p62_p12 }
  0x87   : > { %s2875_s17 = scalar_select %p2586_p4, 1, 0 }
  0x88   : > { %s2874_s14 = scalar_select %p2582_p2, 1, 0 }
  0x89   : > { %s2591_s19 = scalar_select %p47_p13, %s2337_s26, %s49_s16  }
  0x8a   : > { %s2876_s20 = scalar_select %p2593_p9, 1, 0 }
  0x8b   : > { %s2599_s22 = sand.u32 1, %s2337_s26   ;;  %s1680_s23 = sshll.u32 %s2345_s28, 6 }
  0x8c   : > { %s1679_s9 = sshll.u32 %s2599_s22, 2  ;;  %s2877_s0 = sld [smem:[#allocation20_spill]] }
  0x8d   : > { %s315_s7 = scalar_lea.vmem [#allocation2], %s1679_s9  ;;  %p2610_p10 = pnand %p2012_p5, %p2571_p11 }
  0x8e   : > { %s323_s11 = sshll.u32 %s315_s7, 4  ;;  %s312_s2 = scalar_lea.sflag [#allocation3], %s2599_s22  ;;  %s2614_s11 = int_to_ptr.vmem [resolvable:$true] %s323_s11 }
  0x8f   : > { %p2193_p1 = pneg %p2610_p10 }
  0x92   : > { %s2606_s13 = scalar_lea.hbm %s2877_s0, %s1680_s23  ;;  %s2196_s9 = scalar_lea.hbm %s2877_s0, 128 }
  0x93   : > { %s2191_s10 = scalar_lea.hbm %s2606_s13, 64  ;;  %p2197_p11 = scmp.lt.u32.totalorder %s2606_s13, %s2877_s0 }
  0x94   : > { %p2192_p8 = scmp.ne.s32.totalorder %s2606_s13, %s2191_s10  ;;  %p2198_p6 = scmp.lt.u32.totalorder %s2196_s9, %s2191_s10 }
  0x95   : > { %p2200_p0 = scmp.lt.u32.totalorder %s2191_s10, %s2606_s13 }
  0x96   : > { %p2194_p3 = pnand %p2193_p1, %p2192_p8  ;;  %p2199_p13 = por %p2198_p6, %p2197_p11 }
  0x98   : > { %p2195_p12 = pneg %p2194_p3  ;;  %p2201_p7 = por %p2200_p0, %p2199_p13 }
  0x9a   : > { %p2202_p5 = pnand %p2201_p7, %p2195_p12 }
  0x9c   : > { %2205 = shalt.err (!%p2202_p5)
}
  0x9d   : > { %s2206_s12 = scalar_lea.vmem %s2614_s11, 64  ;;  %s2357_s23 = smov [#allocation2]  }
  0x9e   : > { %p2207_p8 = scmp.ne.s32.totalorder %s2614_s11, %s2206_s12  ;;  %s2211_s18 = sshll.u32 %s2357_s23, 4  ;;  %s2212_s18 = int_to_ptr.vmem [resolvable:$false] %s2211_s18 }
  0x9f   : > { %s2213_s15 = scalar_lea.vmem %s2212_s18, 128  ;;  %p2214_p4 = scmp.lt.s32.totalorder %s2614_s11, %s2212_s18 }
  0xa0   : > { %p2209_p3 = pnand %p2207_p8, %p2193_p1  ;;  %p2215_p11 = scmp.lt.s32.totalorder %s2213_s15, %s2206_s12 }
  0xa2   : > { %p2210_p9 = pneg %p2209_p3  ;;  %p2216_p6 = por %p2215_p11, %p2214_p4 }
  0xa4   : > { %p2217_p13 = pnand %p2216_p6, %p2210_p9 }
  0xa6   : > { %2220 = shalt.err (!%p2217_p13)
}
  0xa7   : > { %2000 = dma.hbm_to_vmem [thread:$0]  (!%p2610_p10), %s2606_s13, 64, %s2614_s11, %s312_s2  }
  0xa8   : > { %s1681_s10 = sshll.u32 %s2599_s22, 3  ;;  %s1682_s9 = sshll.u32 %s2345_s28, 7 }
  0xa9   : > { %s2648_s0 = scalar_lea.hbm %s2849_s1, %s1682_s9  ;;  %s334_s12 = scalar_lea.vmem [#allocation5], %s1681_s10 }
  0xaa   : > { %s342_s18 = sshll.u32 %s334_s12, 4  ;;  %s2879_s15 = sand.u32 1, %s2349_s29   ;;  %s343_s18 = int_to_ptr.vmem [resolvable:$true] %s342_s18 }
  0xab   : > { %s331_s3 = scalar_lea.sflag [#allocation6], %s2879_s15  ;;  %s2221_s4 = scalar_lea.hbm %s2648_s0, 128 }
  0xac   : > { %p2222_p4 = scmp.ne.s32.totalorder %s2648_s0, %s2221_s4  ;;  %s2226_s13 = scalar_lea.hbm %s2849_s1, 256 }
  0xad   : > { %p2227_p0 = scmp.lt.u32.totalorder %s2648_s0, %s2849_s1  ;;  %p2228_p7 = scmp.lt.u32.totalorder %s2226_s13, %s2221_s4 }
  0xae   : > { %p2224_p9 = pnand %p2222_p4, %p2193_p1  ;;  %p2230_p8 = scmp.lt.u32.totalorder %s2221_s4, %s2648_s0 }
  0xaf   : > { %p2229_p5 = por %p2228_p7, %p2227_p0 }
  0xb0   : > { %p2225_p12 = pneg %p2224_p9 }
  0xb1   : > { %p2231_p3 = por %p2230_p8, %p2229_p5 }
  0xb3   : > { %p2232_p11 = pnand %p2231_p3, %p2225_p12 }
  0xb5   : > { %2235 = shalt.err (!%p2232_p11)
}
  0xb6   : > { %s2236_s10 = scalar_lea.vmem %s343_s18, 128  ;;  %s2358_s7 = smov [#allocation5]  }
  0xb7   : > { %p2237_p6 = scmp.ne.s32.totalorder %s343_s18, %s2236_s10  ;;  %s2241_s23 = sshll.u32 %s2358_s7, 4  ;;  %s2242_s23 = int_to_ptr.vmem [resolvable:$false] %s2241_s23 }
  0xb8   : > { %s2243_s12 = scalar_lea.vmem %s2242_s23, 256  ;;  %p2244_p9 = scmp.lt.s32.totalorder %s343_s18, %s2242_s23 }
  0xb9   : > { %p2239_p13 = pnand %p2237_p6, %p2193_p1  ;;  %p2245_p2 = scmp.lt.s32.totalorder %s2243_s12, %s2236_s10 }
  0xbb   : > { %p2240_p4 = pneg %p2239_p13  ;;  %p2246_p0 = por %p2245_p2, %p2244_p9 }
  0xbd   : > { %p2247_p7 = pnand %p2246_p0, %p2240_p4 }
  0xbf   : > { %2250 = shalt.err (!%p2247_p7)
}
  0xc0   : > { %2003 = dma.hbm_to_vmem [thread:$0]  (!%p2610_p10), %s2648_s0, 128, %s343_s18, %s331_s3  }
  0xc1   : > { %p2880_p12 = scmp.ne.s32.totalorder %s2866_s8, 0 }
  0xc2   : > { %s2674_s4 = sand.u32 (!%p2880_p12), 1, %s2333_s25   ;;  %p2881_p2 = scmp.ne.s32.totalorder (!%p2880_p12), %s2874_s14, 0 }
  0xc3   : > { %351 = sbr.rel (%p2880_p12) target bundleno = 944 (0x3b0), region = 48  ;;  %s1684_s15 = sshll.u32 (!%p2880_p12), %s2674_s4, 2 }
  0xc4   : > { %s354_s2 = scalar_lea.sflag (!%p2880_p12), [#allocation3], %s2674_s4  ;;  %s2678_s22 = scalar_lea.vmem (!%p2880_p12), [#allocation2], %s1684_s15 }
  0xca   : > { %2304 = dma.done.wait (%p2881_p2), %s354_s2, 64  }
  0xcb   : > { %2306 = vsyncadd (%p2881_p2), %s354_s2, 4294967232  ;;  %s362_s0 = sand.u32 1, %s2438_s30   ;;  %s1685_s3 = sshll.u32 %s2674_s4, 3 }
  0xcc   : > { %s363_s8 = scalar_lea.sflag [#allocation6], %s362_s0  ;;  %s2688_s16 = scalar_lea.vmem [#allocation5], %s1685_s3 }
  0xcd   : > { %2308 = dma.done.wait (%p2881_p2), %s363_s8, 128  }
  0xce   : > { %2310 = vsyncadd (%p2881_p2), %s363_s8, 4294967168  ;;  %p2882_p10 = scmp.eq.s32.totalorder %s2438_s30, 0 }
  0xd0   : > { %2312 = dma.done.wait (%p2882_p10), [#allocation6], 256   ;;  %p2883_p1 = pmov %p2882_p10 }
  0xd2   : > { %2314 = vsyncadd (%p2883_p1), [#allocation6], 4294967040  ;;  %p2884_p5 = pmov %p2883_p1 }
  0xd3   : > { %p2885_p8 = pmov %p2883_p1 }
  0xd4   : > { %2316 = dma.done.wait (%p2884_p5), [#allocation9], 4608  }
  0xd5   : > { %2318 = vsyncadd (%p2885_p8), [#allocation9], 4294962688  ;;  %p2886_p3 = pmov %p2883_p1 }
  0xd6   : > { %p2887_p11 = pmov %p2883_p1 }
  0xd7   : > { %2320 = dma.done.wait (%p2886_p3), [#allocation12], 512  }
  0xd8   : > { %2322 = vsyncadd (%p2887_p11), [#allocation12], 4294966784  ;;  %v2359_v0 = vmov 0.0|0.0   ;;  %vm2360_vm0 = vmmov 0   ;;  %v2361_v1 = vmov 0.0   ;;  %v426_v2 = vld [vmem:[#allocation7] sm:$0xff] }
  0xd9   : > { %1893 = vmatprep.subr.bf16.mxu0 %v2359_v0  ;;  %1896 = vmatprep.subr.bf16.mxu1 %v2359_v0  ;;  %v427_v3 = vld [vmem:[#allocation7 + $0x8] sm:$0xff]  ;;  %v502_v4 = vld [vmem:[#allocation8] sm:$0xff]  ;;  %v503_v6 = vld [vmem:[#allocation8 + $0x8] sm:$0xff]  ;;  %vm428_vm1 = vcmask 130048   ;;  %vm506_vm2 = vcmask 261120   ;;  %vm1308_vm3 = vcmask 1040384  }
  0xda   : > { %1769 = vmatprep.mubr.msk.f32.mxu0 %vm2360_vm0, %v2361_v1  ;;  %1780 = vmatprep.mubr.msk.f32.mxu1 %vm2360_vm0, %v2361_v1  ;;  %v1894_v5 = vpack.c.bf16 %v427_v3, %v426_v2  ;;  %v504_v7 = vld [vmem:[#allocation8 + $0x10] sm:$0xff]  ;;  %v1897_v8 = vpack.c.bf16 %v503_v6, %v502_v4  ;;  %v505_v9 = vld [vmem:[#allocation8 + $0x18] sm:$0xff]  ;;  %v651_v10 = vld [vmem:[#allocation10] sm:$0xff]  ;;  %vm1310_vm4 = vcmask 1041408   ;;  %vm1312_vm5 = vcmask 1042432   ;;  %s2364_s30 = smov 96  }
  0xdb   : > { %v652_v11 = vld [vmem:[#allocation10 + $0x8] sm:$0xff]  ;;  %v419_v12 = vld [vmem:[%s2678_s22] sm:$0xf]  ;;  %v1900_v14 = vpack.c.bf16 %v505_v9, %v504_v7  ;;  %v653_v15 = vld [vmem:[#allocation10 + $0x10] sm:$0xff]  ;;  %vm1314_vm6 = vcmask 1043456   ;;  %vm1316_vm7 = vcmask 1044480  }
  0xdc   : > { %1895 = vmatpush3.bf16.msra.mxu0 %v1894_v5  ;;  %v1903_v13 = vpack.c.bf16 %v652_v11, %v651_v10  ;;  %1898 = vmatpush3.bf16.msra.mxu1 %v1897_v8  ;;  %v654_v16 = vld [vmem:[#allocation10 + $0x18] sm:$0xff]  ;;  %v728_v17 = vld [vmem:[#allocation10 + $0x20] sm:$0xff]  ;;  %v729_v18 = vld [vmem:[#allocation10 + $0x28] sm:$0xff]  ;;  %vm1318_vm8 = vcmask 1045504   ;;  %vm1320_vm9 = vcmask 1046528   ;;  %s2365_s13 = smov 64  }
  0xdd   : > { %1902 = vmatprep.subr.bf16.mxu0 %v2359_v0  ;;  %1899 = vmatprep.subr.bf16.mxu1 %v2359_v0  ;;  %v1906_v19 = vpack.c.bf16 %v654_v16, %v653_v15  ;;  %v2718_v20 = vld [vmem:[%s2688_s16] sm:$0xff]  ;;  %v1909_v21 = vpack.c.bf16 %v729_v18, %v728_v17  ;;  %v730_v24 = vld [vmem:[#allocation10 + $0x30] sm:$0xff]  ;;  %v731_v25 = vld [vmem:[#allocation10 + $0x38] sm:$0xff]  ;;  %v2363_v16 = vmov 1983009808   ;;  %s1704_s11 = sshll.u32 %s2341_s27, 7 }
  0xde   : > { %v808_v22 = vld [vmem:[#allocation10 + $0x40] sm:$0xff]  ;;  %v809_v23 = vld [vmem:[#allocation10 + $0x48] sm:$0xff]  ;;  %v1912_v27 = vpack.c.bf16 %v731_v25, %v730_v24  ;;  %v810_v28 = vld [vmem:[#allocation10 + $0x50] sm:$0xff]  ;;  %v732_v32 = vrot.slane %v2718_v20, 1  ;;  %v812_v39 = vrot.slane %v2718_v20, 2  ;;  %v892_v46 = vrot.slane %v2718_v20, 3 }
  0xdf   : > { %1770 = vmatmul.mubr.msk.f32.vlgmr.msra.gmra.mrb[0].mxu0 %vm428_vm1, %v419_v12  ;;  %v1915_v26 = vpack.c.bf16 %v809_v23, %v808_v22  ;;  %v811_v29 = vld [vmem:[#allocation10 + $0x58] sm:$0xff]  ;;  %v888_v30 = vld [vmem:[#allocation10 + $0x60] sm:$0xff]  ;;  %v889_v31 = vld [vmem:[#allocation10 + $0x68] sm:$0xff]  ;;  %v972_v53 = vrot.slane %v2718_v20, 4  ;;  %v1052_v60 = vrot.slane %v2718_v20, 5  ;;  %v1132_v3 = vrot.slane %v2718_v20, 6 }
  0xe0   : > { %1904 = vmatpush3.bf16.msra.mxu0 %v1903_v13  ;;  %1791 = vmatprep.mubr.msk.f32.mxu0 %vm2360_vm0, %v2361_v1  ;;  %v1918_v33 = vpack.c.bf16 %v811_v29, %v810_v28  ;;  %v1921_v34 = vpack.c.bf16 %v889_v31, %v888_v30  ;;  %v968_v35 = vld [vmem:[#allocation10 + $0x80] sm:$0xff]  ;;  %v969_v36 = vld [vmem:[#allocation10 + $0x88] sm:$0xff]  ;;  %v890_v37 = vld [vmem:[#allocation10 + $0x70] sm:$0xff]  ;;  %v1212_v5 = vrot.slane %v2718_v20, 7  ;;  %v585_v12 = vlaneseq  ;;  %s417_s9 = scalar_lea.vmem [#allocation13], %s1685_s3  ;;  %s2888_s12 = sld [smem:[#allocation24_spill]] }
  0xe1   : > { %1901 = vmatpush3.bf16.msra.mxu1 %v1900_v14  ;;  %1905 = vmatprep.subr.bf16.mxu0 %v2359_v0  ;;  %v891_v38 = vld [vmem:[#allocation10 + $0x78] sm:$0xff]  ;;  %v1927_v40 = vpack.c.bf16 %v969_v36, %v968_v35  ;;  %v970_v42 = vld [vmem:[#allocation10 + $0x90] sm:$0xff]  ;;  %v1048_v44 = vld [vmem:[#allocation10 + $0xa0] sm:$0xff]  ;;  %v2362_v13 = vmov 1966171168   ;;  %v583_v17 = vunpack.c.l.s4 %v2363_v16  ;;  %s1527_s10 = sshll.u32 %s417_s9, 4  ;;  %s2801_s10 = int_to_ptr.vmem [resolvable:$true] %s1527_s10 }
  0xe2   : > { %1908 = vmatprep.subr.bf16.mxu1 %v2359_v0  ;;  %v1924_v41 = vpack.c.bf16 %v891_v38, %v890_v37  ;;  %v971_v43 = vld [vmem:[#allocation10 + $0x98] sm:$0xff]  ;;  %v1049_v45 = vld [vmem:[#allocation10 + $0xa8] sm:$0xff]  ;;  %v1128_v49 = vld [vmem:[#allocation10 + $0xc0] sm:$0xff]  ;;  %v604_v14 = vunpack.c.l.s4 %v2362_v13  ;;  %v2775_v15 = vshrl.u32 %v585_v12, 7  ;;  %vm1509_vm10 = vcmask 523264   ;;  %s1513_s2 = scalar_lea.sflag [#allocation4], %s2674_s4 }
  0xe3   : > { %v1930_v47 = vpack.c.bf16 %v971_v43, %v970_v42  ;;  %v1933_v48 = vpack.c.bf16 %v1049_v45, %v1048_v44  ;;  %v1129_v50 = vld [vmem:[#allocation10 + $0xc8] sm:$0xff]  ;;  %v1050_v51 = vld [vmem:[#allocation10 + $0xb0] sm:$0xff]  ;;  %v1051_v52 = vld [vmem:[#allocation10 + $0xb8] sm:$0xff]  ;;  %s2251_s27 = scalar_lea.vmem %s2801_s10, 128  ;;  %p2889_p13 = scmp.ne.s32.totalorder %s2875_s17, 0 }
  0xe4   : > { %1781 = vmatmul.mubr.msk.f32.vlgmr.msra.gmra.mrb[0].mxu1 %vm506_vm2, %v2718_v20  ;;  %1907 = vmatpush3.bf16.msra.mxu0 %v1906_v19  ;;  %v1939_v54 = vpack.c.bf16 %v1129_v50, %v1128_v49  ;;  %v1936_v55 = vpack.c.bf16 %v1051_v52, %v1050_v51  ;;  %v1130_v56 = vld [vmem:[#allocation10 + $0xd0] sm:$0xff]  ;;  %v1131_v57 = vld [vmem:[#allocation10 + $0xd8] sm:$0xff]  ;;  %v1208_v58 = vld [vmem:[#allocation10 + $0xe0] sm:$0xff]  ;;  %v584_v19 = vunpack.c.0.s8 %v583_v17  ;;  %v2779_v22 = vsub.s32 0, %v2775_v15  ;;  %p2252_p6 = scmp.ne.s32.totalorder %s2801_s10, %s2251_s27  ;;  %s2366_s22 = smov [#allocation13]  }
  0xe5   : > { %1910 = vmatpush3.bf16.msra.mxu1 %v1909_v21  ;;  %1914 = vmatprep.subr.bf16.mxu0 %v2359_v0  ;;  %v1209_v59 = vld [vmem:[#allocation10 + $0xe8] sm:$0xff]  ;;  %v1942_v61 = vpack.c.bf16 %v1131_v57, %v1130_v56  ;;  %v1210_v63 = vld [vmem:[#allocation10 + $0xf0] sm:$0xff]  ;;  %v1211_v2 = vld [vmem:[#allocation10 + $0xf8] sm:$0xff]  ;;  %s2255_s0 = sshll.u32 %s2366_s22, 4  ;;  %s2256_s0 = int_to_ptr.vmem [resolvable:$false] %s2255_s0 }
  0xe6   : > { %1911 = vmatprep.subr.bf16.mxu1 %v2359_v0  ;;  %1802 = vmatprep.mubr.msk.f32.mxu1 %vm2360_vm0, %v2361_v1  ;;  %v1945_v62 = vpack.c.bf16 %v1209_v59, %v1208_v58  ;;  %v1948_v4 = vpack.c.bf16 %v1211_v2, %v1210_v63  ;;  %v421_v6 = vld [vmem:[#allocation11] sm:$0xff]  ;;  %v422_v7 = vld [vmem:[#allocation11 + $0x8] sm:$0xff]  ;;  %v423_v9 = vld [vmem:[#allocation11 + $0x10] sm:$0xff]  ;;  %v587_v23 = vsub.s32 %v584_v19, %v2775_v15  ;;  %s2799_s15 = scalar_lea.hbm %s2888_s12, %s1704_s11  ;;  %p2253_p4 = pnand %p2252_p6, %p2889_p13 }
  0xe7   : > { %1792 = vmatmul.mubr.msk.f32.vlgmr.msra.gmra.mrb[2].mxu0 %vm506_vm2, %v2718_v20  ;;  %v1951_v8 = vpack.c.bf16 %v422_v7, %v421_v6  ;;  %v424_v10 = vld [vmem:[#allocation11 + $0x18] sm:$0xff]  ;;  %s2257_s3 = scalar_lea.vmem %s2256_s0, 256  ;;  %p2258_p0 = scmp.lt.s32.totalorder %s2801_s10, %s2256_s0 }
  0xe8   : > { %1916 = vmatpush3.bf16.msra.mxu0 %v1915_v26  ;;  %1813 = vmatprep.mubr.msk.f32.mxu0 %vm2360_vm0, %v2361_v1  ;;  %v1954_v11 = vpack.c.bf16 %v424_v10, %v423_v9  ;;  %p2254_p9 = pneg %p2253_p4  ;;  %p2259_p7 = scmp.lt.s32.totalorder %s2257_s3, %s2251_s27 }
  0xe9   : > { %1913 = vmatpush3.bf16.msra.mxu1 %v1912_v27  ;;  %1917 = vmatprep.subr.bf16.mxu0 %v2359_v0 }
  0xea   : > { %1920 = vmatprep.subr.bf16.mxu1 %v2359_v0  ;;  %p2260_p12 = por %p2259_p7, %p2258_p0 }
  0xec   : > { %1803 = vmatmul.mubr.msk.f32.vlgmr.msra.gmra.mrb[2].mxu1 %vm506_vm2, %v732_v32  ;;  %1919 = vmatpush3.bf16.msra.mxu0 %v1918_v33  ;;  %p2261_p2 = pnand %p2260_p12, %p2254_p9 }
  0xed   : > { %1922 = vmatpush3.bf16.msra.mxu1 %v1921_v34  ;;  %1926 = vmatprep.subr.bf16.mxu0 %v2359_v0 }
  0xee   : > { %1923 = vmatprep.subr.bf16.mxu1 %v2359_v0  ;;  %1824 = vmatprep.mubr.msk.f32.mxu1 %vm2360_vm0, %v2361_v1 }
  0xef   : > { %1814 = vmatmul.mubr.msk.f32.vlgmr.msra.gmra.mrb[4].mxu0 %vm506_vm2, %v812_v39 }
  0xf0   : > { %1928 = vmatpush3.bf16.msra.mxu0 %v1927_v40  ;;  %1835 = vmatprep.mubr.msk.f32.mxu0 %vm2360_vm0, %v2361_v1 }
  0xf1   : > { %1925 = vmatpush3.bf16.msra.mxu1 %v1924_v41  ;;  %1929 = vmatprep.subr.bf16.mxu0 %v2359_v0 }
  0xf2   : > { %1932 = vmatprep.subr.bf16.mxu1 %v2359_v0 }
  0xf4   : > { %1825 = vmatmul.mubr.msk.f32.vlgmr.msra.gmra.mrb[4].mxu1 %vm506_vm2, %v892_v46  ;;  %1931 = vmatpush3.bf16.msra.mxu0 %v1930_v47 }
  0xf5   : > { %1934 = vmatpush3.bf16.msra.mxu1 %v1933_v48  ;;  %1938 = vmatprep.subr.bf16.mxu0 %v2359_v0 }
  0xf6   : > { %1935 = vmatprep.subr.bf16.mxu1 %v2359_v0  ;;  %1846 = vmatprep.mubr.msk.f32.mxu1 %vm2360_vm0, %v2361_v1 }
  0xf7   : > { %1836 = vmatmul.mubr.msk.f32.vlgmr.msra.gmra.mrb[6].mxu0 %vm506_vm2, %v972_v53 }
  0xf8   : > { %1940 = vmatpush3.bf16.msra.mxu0 %v1939_v54  ;;  %1857 = vmatprep.mubr.msk.f32.mxu0 %vm2360_vm0, %v2361_v1 }
  0xf9   : > { %1937 = vmatpush3.bf16.msra.mxu1 %v1936_v55  ;;  %1941 = vmatprep.subr.bf16.mxu0 %v2359_v0 }
  0xfa   : > { %1944 = vmatprep.subr.bf16.mxu1 %v2359_v0 }
  0xfc   : > { %1847 = vmatmul.mubr.msk.f32.vlgmr.msra.gmra.mrb[6].mxu1 %vm506_vm2, %v1052_v60  ;;  %1943 = vmatpush3.bf16.msra.mxu0 %v1942_v61 }
  0xfd   : > { %1946 = vmatpush3.bf16.msra.mxu1 %v1945_v62  ;;  %1868 = vmatprep.mubr.msk.f32.mxu1 %vm2360_vm0, %v2361_v1 }
  0xfe   : > { %1947 = vmatprep.subr.bf16.mxu1 %v2359_v0  ;;  %1950 = vmatprep.subr.bf16.mxu0 %v2359_v0 }
  0xff   : > { %1858 = vmatmul.mubr.msk.f32.vlgmr.msra.gmra.mrb[8].mxu0 %vm506_vm2, %v1132_v3 }
 0x100   : > { %1879 = vmatprep.mubr.msk.f32.mxu0 %vm2360_vm0, %v2361_v1  ;;  %1952 = vmatpush3.bf16.msra.mxu0 %v1951_v8 }
 0x101   : > { %1949 = vmatpush3.bf16.msra.mxu1 %v1948_v4  ;;  %1953 = vmatprep.subr.bf16.mxu0 %v2359_v0 }
 0x102   : > { %1956 = vmatprep.subr.bf16.mxu1 %v2359_v0 }
 0x104   : > { %1869 = vmatmul.mubr.msk.f32.vlgmr.msra.gmra.mrb[8].mxu1 %vm506_vm2, %v1212_v5  ;;  %1955 = vmatpush3.bf16.msra.mxu0 %v1954_v11 }
 0x105   : > { %1890 = vmatprep.mubr.msk.f32.mxu1 %vm2360_vm0, %v2361_v1  ;;  %1958 = vmatpush3.bf16.msra.mxu1 %v1951_v8  ;;  %v605_v1 = vunpack.c.0.s8 %v604_v14 }
 0x106   : > { %1959 = vmatprep.subr.bf16.mxu1 %v2359_v0 }
 0x107   : > { %v608_v18 = vsub.s32 %v605_v1, %v2775_v15 }
 0x109   : > { %1961 = vmatpush3.bf16.msra.mxu1 %v1954_v11 }
 0x1b2   : > { %v498_v20 = vpop.f32.mrb[0].mxu0 }
 0x1b3   : > { %v609_v21 = vrot.slane %v498_v20, %v608_v18  ;;  %v1771_v0 = vpop.f32.mrb[1].mxu0 }
 0x1b5   : > { %v610_v24 = vcombine.high %v609_v21, %v609_v21  ;;  %v617_v25 = vrot.slane %v609_v21, %v608_v18 }
 0x1b7   : > { %v624_v26 = vrot.slane %v610_v24, %v608_v18  ;;  %v625_v27 = vcombine.high %v617_v25, %v617_v25  ;;  %v630_v28 = vrot.slane %v617_v25, %v2779_v22  ;;  %v576_v29 = vpop.f32.mrb[0].mxu1 }
 0x1b8   : > { %v581_v30 = vcombine.high %v576_v29, %v576_v29  ;;  %v588_v31 = vrot.slane %v576_v29, %v587_v23  ;;  %v1782_v32 = vpop.f32.mrb[1].mxu1 }
 0x1b9   : > { %v626_v33 = vcombine.high %v624_v26, %v624_v26  ;;  %v634_v34 = vrot.slane %v624_v26, %v2779_v22  ;;  %v638_v35 = vrot.slane %v625_v27, %v2779_v22 }
 0x1ba   : > { %v595_v36 = vrot.slane %v581_v30, %v587_v23  ;;  %v596_v37 = vcombine.high %v588_v31, %v588_v31  ;;  %v647_v38 = vadd.f32 %v630_v28, %v588_v31  ;;  %v721_v39 = vpop.f32.mrb[2].mxu0 }
 0x1bb   : > { %v642_v40 = vrot.slane %v626_v33, %v2779_v22  ;;  %v1793_v41 = vpop.f32.mrb[3].mxu0  ;;  %v725_v48 = vmul.f32 0.2, %v721_v39 }
 0x1bc   : > { %v597_v42 = vcombine.high %v595_v36, %v595_v36  ;;  %v648_v43 = vadd.f32 %v634_v34, %v596_v37  ;;  %v649_v44 = vadd.f32 %v638_v35, %v595_v36  ;;  %v1500_v36 = vsub.s32 1, %v2775_v15  ;;  %v425_v37 = vld [vmem:[%s2854_s6] sm:$0x3] }
 0x1bd   : > { %v726_v58 = vmax.f32 %v721_v39, %v725_v48 }
 0x1be   : > { %v650_v45 = vadd.f32 %v642_v40, %v597_v42  ;;  %v1326_v46 = vcombine.low %v647_v38, %v648_v43  ;;  %v1501_v38 = vrot.slane %v425_v37, %v1500_v36 }
 0x1bf   : > { %v801_v47 = vpop.f32.mrb[2].mxu1 }
 0x1c0   : > { %v805_v49 = vmul.f32 0.2, %v801_v47  ;;  %v1804_v50 = vpop.f32.mrb[3].mxu1  ;;  %v1327_v51 = vcombine.low %v649_v44, %v650_v45  ;;  %v1334_v54 = vrot.slane %v1326_v46, %v587_v23  ;;  %v1420_v46 = vrot.slane %v425_v37, %v2779_v22 }
 0x1c2   : > { %v806_v52 = vmax.f32 %v801_v47, %v805_v49  ;;  %v881_v53 = vpop.f32.mrb[4].mxu0  ;;  %v1341_v55 = vrot.slane %v1327_v51, %v587_v23 }
 0x1c3   : > { %v885_v56 = vmul.f32 0.2, %v881_v53  ;;  %v1815_v57 = vpop.f32.mrb[5].mxu0 }
 0x1c4   : > { %v1288_v59 = vrot.slane %v806_v52, 7  ;;  %v1342_v60 = vcombine.low %v1334_v54, %v1341_v55 }
 0x1c5   : > { %v886_v61 = vmax.f32 %v881_v53, %v885_v56 }
 0x1c6   : > { %v1309_v62 = vsel %vm1308_vm3, %v726_v58, %v1288_v59 }
 0x1c7   : > { %v1291_v63 = vrot.slane %v886_v61, 6  ;;  %v961_v2 = vpop.f32.mrb[4].mxu1 }
 0x1c8   : > { %v965_v3 = vmul.f32 0.2, %v961_v2  ;;  %v1826_v4 = vpop.f32.mrb[5].mxu1 }
 0x1c9   : > { %v1311_v5 = vsel %vm1310_vm4, %v1309_v62, %v1291_v63 }
 0x1ca   : > { %v966_v6 = vmax.f32 %v961_v2, %v965_v3  ;;  %v1041_v7 = vpop.f32.mrb[6].mxu0 }
 0x1cb   : > { %v1045_v8 = vmul.f32 0.2, %v1041_v7  ;;  %v1837_v9 = vpop.f32.mrb[7].mxu0 }
 0x1cc   : > { %v1294_v10 = vrot.slane %v966_v6, 5 }
 0x1cd   : > { %v1046_v11 = vmax.f32 %v1041_v7, %v1045_v8 }
 0x1ce   : > { %v1313_v12 = vsel %vm1312_vm5, %v1311_v5, %v1294_v10 }
 0x1cf   : > { %v1297_v13 = vrot.slane %v1046_v11, 4  ;;  %v1121_v14 = vpop.f32.mrb[6].mxu1 }
 0x1d0   : > { %v1125_v1 = vmul.f32 0.2, %v1121_v14  ;;  %v1848_v16 = vpop.f32.mrb[7].mxu1 }
 0x1d1   : > { %v1315_v17 = vsel %vm1314_vm6, %v1313_v12, %v1297_v13 }
 0x1d2   : > { %v1126_v18 = vmax.f32 %v1121_v14, %v1125_v1  ;;  %v1201_v19 = vpop.f32.mrb[8].mxu0 }
 0x1d3   : > { %v1205_v20 = vmul.f32 0.2, %v1201_v19  ;;  %v1859_v21 = vpop.f32.mrb[9].mxu0 }
 0x1d4   : > { %v1300_v0 = vrot.slane %v1126_v18, 3 }
 0x1d5   : > { %v1206_v23 = vmax.f32 %v1201_v19, %v1205_v20 }
 0x1d6   : > { %v1317_v24 = vsel %vm1316_vm7, %v1315_v17, %v1300_v0 }
 0x1d7   : > { %v1303_v25 = vrot.slane %v1206_v23, 2  ;;  %v1281_v26 = vpop.f32.mrb[8].mxu1 }
 0x1d8   : > { %v1285_v27 = vmul.f32 0.2, %v1281_v26  ;;  %v1870_v28 = vpop.f32.mrb[9].mxu1 }
 0x1d9   : > { %v1319_v29 = vsel %vm1318_vm8, %v1317_v24, %v1303_v25 }
 0x1da   : > { %v1286_v30 = vmax.f32 %v1281_v26, %v1285_v27 }
 0x1dc   : > { %v1306_v31 = vrot.slane %v1286_v30, 1 }
 0x1de   : > { %v1321_v32 = vsel %vm1320_vm9, %v1319_v29, %v1306_v31 }
 0x1df   : > { %1424 = vrot.lane.b32.xlu0 %v1321_v32, %s2364_s30  ;;  %1880 = vmatmul.mubr.msk.f32.vlgmr.msra.gmra.mrb[10].mxu0 %vm506_vm2, %v1321_v32 }
 0x251   : > { %v1425_v33 = vpop.permute.xlu0 %1424 }
 0x252   : > { %1891 = vmatmul.mubr.msk.f32.vlgmr.msra.gmra.mrb[10].mxu1 %vm506_vm2, %v1425_v33 }
 0x2b2   : > { %v1413_v34 = vpop.f32.mrb[10].mxu0 }
 0x2b3   : > { %v1881_v35 = vpop.f32.mrb[11].mxu0  ;;  %v1414_v45 = vadd.f32 %v1413_v34, %v1342_v60 }
 0x2b5   : > { %v1421_v15 = vadd.f32 %v1420_v46, %v1414_v45 }
 0x2b7   : > { %v1422_v47 = vmul.f32 0.2, %v1421_v15 }
 0x2b9   : > { %v1423_v48 = vmax.f32 %v1421_v15, %v1422_v47 }
 0x325   : > { %v1494_v39 = vpop.f32.mrb[10].mxu1 }
 0x326   : > { %v1495_v40 = vadd.f32 %v1494_v39, %v1342_v60  ;;  %v1892_v41 = vpop.f32.mrb[11].mxu1 }
 0x328   : > { %v1502_v42 = vadd.f32 %v1501_v38, %v1495_v40 }
 0x32a   : > { %v1503_v43 = vmul.f32 0.2, %v1502_v42 }
 0x32c   : > { %v1504_v44 = vmax.f32 %v1502_v42, %v1503_v43 }
 0x32e   : > { %1506 = vrot.lane.b32.xlu0 %v1504_v44, %s2365_s13 }
 0x3a0   : > { %v1507_v49 = vpop.permute.xlu0 %1506 }
 0x3a1   : > { %v1510_v22 = vsel %vm1509_vm10, %v1423_v48, %v1507_v49 }
 0x3a2   : > { %1511 = vst [vmem:[%s417_s9] sm:$0xff] %v1510_v22 }
 0x3a3   : > { %2264 = shalt.err (!%p2261_p2)
}
 0x3a4   : > { %s2265_s4 = scalar_lea.hbm %s2799_s15, 128  ;;  %s2269_s30 = scalar_lea.hbm %s2888_s12, 256 }
 0x3a5   : > { %p2266_p10 = scmp.ne.s32.totalorder %s2799_s15, %s2265_s4  ;;  %p2270_p8 = scmp.lt.u32.totalorder %s2799_s15, %s2888_s12 }
 0x3a6   : > { %p2271_p3 = scmp.lt.u32.totalorder %s2269_s30, %s2265_s4  ;;  %p2273_p6 = scmp.lt.u32.totalorder %s2265_s4, %s2799_s15 }
 0x3a7   : > { %p2267_p1 = pnand %p2266_p10, %p2889_p13 }
 0x3a8   : > { %p2272_p11 = por %p2271_p3, %p2270_p8 }
 0x3a9   : > { %p2268_p5 = pneg %p2267_p1 }
 0x3aa   : > { %p2274_p4 = por %p2273_p6, %p2272_p11 }
 0x3ac   : > { %p2275_p9 = pnand %p2274_p4, %p2268_p5 }
 0x3ae   : > { %2278 = shalt.err (!%p2275_p9)
}
 0x3af   : > { %1982 = dma.vmem_to_hbm [thread:$0]  (%p2889_p13), %s2801_s10, 128, %s2799_s15, %s1513_s2  }
 0x3b0 PF: > { %s1539_s13 = sand.u32 1, %s2329_s24   ;;  %p2890_p0 = scmp.ne.s32.totalorder %s2876_s20, 0 }
 0x3b1   : > { %p2891_p7 = scmp.ge.s32.totalorder %s2349_s29, 2  ;;  %s1540_s11 = scalar_lea.sflag [#allocation4], %s1539_s13 }
 0x3b3   : > { %p2005_p12 = pnand %p2891_p7, %p2890_p0 }
 0x3b5   : > { %2324 = dma.done.wait (!%p2005_p12), %s1540_s11, 128  }
 0x3b6   : > { %2326 = vsyncadd (!%p2005_p12), %s1540_s11, 4294967168  ;;  %s28_s29 = sadd.s32 1, %s2349_s29   ;;  %s2892_s24 = smov %s2333_s25 }
 0x3b7   : > { %p25_p2 = scmp.ge.s32.totalorder %s28_s29, 4   ;;  %s2893_s25 = smov %s2337_s26 }
 0x3b8   : > { %s2894_s26 = smov %s2591_s19  ;;  %s2895_s27 = smov %s2345_s28 }
 0x3b9   : > { %s2896_s28 = smov %s2898_s21  ;;  %27 = sbr.rel (!%p25_p2) target bundleno = 16 (0x10), region = 130 }
 0x3c0   :  { %1545 = vsyncpa [#allocation3], 1 }
 0x3c1   :  { %1547 = vsyncpa [#allocation3 + $0x1], 1 }
 0x3c2   :  { %1548 = vsyncpa [#allocation6], 1 }
 0x3c3   :  { %1550 = vsyncpa [#allocation6 + $0x1], 1 }
 0x3c4   :  { %1551 = vsyncpa [#allocation9], 1 }
 0x3c5   :  { %1552 = vsyncpa [#allocation12], 1 }
 0x3c6   :  { %1553 = vsyncpa [#allocation4], 1 }
 0x3c7   :  { %1555 = vsyncpa [#allocation4 + $0x1], 1 }

</bundles_post_ra>
